<compile_context>
chip_gen: v5e
topology: v5e:2x2
jax: 0.10.0
libtpu: 0.0.40
codegen_flags: <defaults>
</compile_context>

<pallas_src>
import functools
import math

import numpy as np
import jax
import jax.numpy as jnp
from jax.experimental import pallas as pl
from jax.experimental.pallas import tpu as pltpu


# ----------------------------- per-generation knobs -----------------------------

def _detect_tpu():
    multi_tc = False   # v7x: 2 TensorCores / chip, 64 MiB VMEM per TC
    big_vmem = False   # v5e / v6e: 1 TC, 128 MiB VMEM
    try:
        kind = jax.devices()[0].device_kind.lower()
        if "v7" in kind or "7x" in kind:
            multi_tc = True
        elif ("v5" in kind) or ("v6" in kind):
            big_vmem = True
    except Exception:
        pass
    return multi_tc, big_vmem


_MULTI_TC, _BIG_VMEM = _detect_tpu()
# 96 MiB on 128 MiB single-TC parts; 40 MiB otherwise (safe under v7x's 64 MiB/TC).
_VMEM_LIMIT = (96 if (_BIG_VMEM and not _MULTI_TC) else 40) * 1024 * 1024


# ----------------------------- tile selection -----------------------------

def _divisors_mult(n, mult, cap):
    """All multiples of `mult` that divide `n` and are <= cap (ascending)."""
    return [d for d in range(mult, min(n, cap) + 1, mult) if n % d == 0]


@functools.lru_cache(maxsize=None)
def _pick_tiles(G, M, K, N, out_bytes):
    m_cap, n_cap, k_cap = (1024, 1024, 4096) if _BIG_VMEM else (512, 512, 2304)
    tms = _divisors_mult(M, 8, m_cap) or [M]
    tns = _divisors_mult(N, 128, n_cap) or [N]
    tks = _divisors_mult(K, 128, k_cap) or [K]
    im, jn, kk = len(tms) - 1, len(tns) - 1, len(tks) - 1

    budget = _VMEM_LIMIT // 2   # leave headroom for compiler scratch / double buffers

    def ws(tm, tn, tk):
        # bf16 x/w double-buffered + out double-buffered + f32 acc + small per-N operands.
        return 4 * (tm * tk + tk * tn) + (2 * out_bytes + 4) * tm * tn + 32 * tn

    while ws(tms[im], tns[jn], tks[kk]) > budget:
        if kk > 0:
            kk -= 1
        elif im > 0:
            im -= 1
        elif jn > 0:
            jn -= 1
        else:
            break
    tm, tn, tk = tms[im], tns[jn], tks[kk]

    # v7x megacore: ensure >= 2 parallel grid steps; split along N (cheap x re-read) before M
    # (weight re-stream).  Single-TC chips get no forced split.
    if _MULTI_TC and G * (M // tm) * (N // tn) == 1:
        if tn % 256 == 0:
            tn //= 2
        elif tm % 16 == 0:
            tm //= 2
    return tm, tn, tk


# ----------------------------- grouped / tiled matmul kernel -----------------------------

def _make_gmm_kernel(act, affine, residual):
    def kernel(*args):
        x_ref, w_ref = args[0], args[1]
        idx = 2
        if affine:
            scale_ref, shift_ref = args[idx], args[idx + 1]
            idx += 2
        if act == "prelu":
            alpha_ref = args[idx]
            idx += 1
        if residual:
            res_ref = args[idx]
            idx += 1
        o_ref, acc_ref = args[idx], args[idx + 1]

        prod = jnp.dot(x_ref[0], w_ref[0], preferred_element_type=jnp.float32)

        @pl.when(pl.program_id(3) == 0)
        def _first():
            acc_ref[...] = prod                 # assign on first K step (no zero-fill pass)

        @pl.when(pl.program_id(3) != 0)
        def _accum():
            acc_ref[...] += prod

        @pl.when(pl.program_id(3) == pl.num_programs(3) - 1)
        def _finish():
            y = acc_ref[...]
            if affine:
                y = y * scale_ref[0] + shift_ref[0]
            if act == "prelu":
                y = jnp.where(y >= 0.0, y, y * alpha_ref[0])
            elif act == "lrelu":                # nn.LeakyReLU default negative_slope=0.01
                y = jnp.where(y >= 0.0, y, y * 0.01)
            elif act == "relu":
                y = jnp.maximum(y, 0.0)
            elif act == "sigmoid":
                y = pl.reciprocal(1.0 + jnp.exp(-y), approx=True)
            if residual:
                y = y + res_ref[0]
            o_ref[0] = y.astype(o_ref.dtype)

    return kernel


@functools.lru_cache(maxsize=None)
def _build_gmm(G, M, K, N, act, affine, residual, out_dtype_name):
    out_dtype = np.dtype(out_dtype_name)
    tm, tn, tk = _pick_tiles(G, M, K, N, out_dtype.itemsize)
    in_specs = [
        pl.BlockSpec((1, tm, tk), lambda g, i, j, k: (g, i, k)),
        pl.BlockSpec((1, tk, tn), lambda g, i, j, k: (g, k, j)),
    ]
    if affine:
        in_specs += [pl.BlockSpec((1, 1, tn), lambda g, i, j, k: (g, 0, j)),
                     pl.BlockSpec((1, 1, tn), lambda g, i, j, k: (g, 0, j))]
    if act == "prelu":
        in_specs += [pl.BlockSpec((1, 1, tn), lambda g, i, j, k: (g, 0, j))]
    if residual:
        in_specs += [pl.BlockSpec((1, tm, tn), lambda g, i, j, k: (g, i, j))]

    flops = 2 * G * M * K * N
    bytes_accessed = G * (M * K * 2 + K * N * 2 + M * N * out_dtype.itemsize)
    if residual:
        bytes_accessed += G * M * N * 4

    fn = pl.pallas_call(
        _make_gmm_kernel(act, affine, residual),
        out_shape=jax.ShapeDtypeStruct((G, M, N), out_dtype),
        grid_spec=pltpu.PrefetchScalarGridSpec(
            num_scalar_prefetch=0,
            grid=(G, M // tm, N // tn, K // tk),
            in_specs=in_specs,
            out_specs=pl.BlockSpec((1, tm, tn), lambda g, i, j, k: (g, i, j)),
            scratch_shapes=[pltpu.VMEM((tm, tn), jnp.float32)],
        ),
        compiler_params=pltpu.CompilerParams(
            dimension_semantics=("parallel", "parallel", "parallel", "arbitrary"),
            vmem_limit_bytes=_VMEM_LIMIT),
        cost_estimate=pl.CostEstimate(
            flops=flops,
            transcendentals=G * M * N if act == "sigmoid" else 0,
            bytes_accessed=bytes_accessed),
    )
    return jax.jit(fn)


def matmul_fused(x, w, scale=None, shift=None, alpha=None, act="none",
                 residual=None, out_dtype=jnp.bfloat16):
    """(G,)M,K x (G,)K,N matmul in bf16 / fp32-accumulate with fused affine, activation and
    optional residual add; output dtype configurable (bf16 activations, fp32 latents)."""
    squeeze = (x.ndim == 2)
    if squeeze:
        x, w = x[None], w[None]
        if residual is not None:
            residual = residual[None]
    G, M, K = x.shape
    Gw, Kw, N = w.shape
    assert G == Gw and K == Kw, (x.shape, w.shape)
    affine = (scale is not None) or (shift is not None)

    args = [x.astype(jnp.bfloat16), w.astype(jnp.bfloat16)]
    if affine:
        s = (jnp.ones((G, 1, N), jnp.float32) if scale is None
             else jnp.asarray(scale, jnp.float32).reshape(G, 1, N))
        b = (jnp.zeros((G, 1, N), jnp.float32) if shift is None
             else jnp.asarray(shift, jnp.float32).reshape(G, 1, N))
        args += [s, b]
    if act == "prelu":
        args.append(jnp.asarray(alpha, jnp.float32).reshape(G, 1, N))
    if residual is not None:
        args.append(jnp.asarray(residual, jnp.float32).reshape(G, M, N))

    out_dtype = np.dtype(out_dtype)
    out = _build_gmm(G, M, K, N, act, affine, residual is not None, out_dtype.name)(*args)
    return out[0] if squeeze else out


# ----------------------------- fused SE + residual kernel -----------------------------

def _se_res_kernel(res_ref, sc_ref, w1_ref, w2_ref, o_ref):
    # AdaptiveAvgPool2d(1) + fc1 + ReLU + fc2 + sigmoid + gate*res + shortcut, all in one pass.
    r = res_ref[0]                                                    # (HW, D) bf16
    pooled = jnp.mean(r.astype(jnp.float32), axis=0, keepdims=True)   # (1, D) f32
    h = jnp.dot(pooled.astype(jnp.bfloat16), w1_ref[...],
                preferred_element_type=jnp.float32)
    h = jnp.maximum(h, 0.0)
    g = jnp.dot(h.astype(jnp.bfloat16), w2_ref[...],
                preferred_element_type=jnp.float32)
    g = pl.reciprocal(1.0 + jnp.exp(-g), approx=True)                 # sigmoid via EUP recip
    out = r.astype(jnp.float32) * g + sc_ref[0].astype(jnp.float32)
    o_ref[0] = out.astype(o_ref.dtype)


@functools.lru_cache(maxsize=None)
def _build_se_residual(NB, HW, D):
    # TODO(synk): at full pSp resolution on v7x, tile the HW axis (arbitrary grid dim + pooled
    #             scratch) instead of blocking the whole (1, HW, D) plane.
    D16 = D // 16
    fn = pl.pallas_call(
        _se_res_kernel,
        out_shape=jax.ShapeDtypeStruct((NB, HW, D), jnp.bfloat16),
        grid_spec=pltpu.PrefetchScalarGridSpec(
            num_scalar_prefetch=0,
            grid=(NB,),
            in_specs=[
                pl.BlockSpec((1, HW, D), lambda n: (n, 0, 0)),
                pl.BlockSpec((1, HW, D), lambda n: (n, 0, 0)),
                pl.BlockSpec((D, D16), lambda n: (0, 0)),
                pl.BlockSpec((D16, D), lambda n: (0, 0)),
            ],
            out_specs=pl.BlockSpec((1, HW, D), lambda n: (n, 0, 0)),
        ),
        compiler_params=pltpu.CompilerParams(
            dimension_semantics=("parallel",), vmem_limit_bytes=_VMEM_LIMIT),
    )
    return jax.jit(fn)


def se_residual(res3, sc3, w1, w2):
    NB, HW, D = res3.shape
    return _build_se_residual(NB, HW, D)(
        res3.astype(jnp.bfloat16), sc3.astype(jnp.bfloat16),
        w1.astype(jnp.bfloat16), w2.astype(jnp.bfloat16))


# ----------------------------- conv lowering (glue fuses under per-shape jit) -----------------------------

def _im2col(x, k, stride, pad):
    NB, H, W, C = x.shape
    xp = jnp.pad(x, ((0, 0), (pad, pad), (pad, pad), (0, 0)))
    oh = (H + 2 * pad - k) // stride + 1
    ow = (W + 2 * pad - k) // stride + 1
    cols = []
    for kh in range(k):
        for kw in range(k):
            cols.append(xp[:, kh:kh + stride * (oh - 1) + 1:stride,
                           kw:kw + stride * (ow - 1) + 1:stride, :])
    patches = jnp.concatenate(cols, axis=-1)               # (NB, oh, ow, k*k*C)
    return patches.reshape(NB * oh * ow, k * k * C), (NB, oh, ow)


@functools.partial(jax.jit, static_argnames=("stride", "pad", "act", "out_dtype"))
def conv2d(x, w, *, stride=1, pad=1, scale=None, shift=None, alpha=None,
           act="none", pre_scale=None, pre_shift=None, residual=None,
           out_dtype=jnp.bfloat16):
    """x: NHWC (bf16 or f32), w: (k,k,Cin,Cout).  Optional pre-conv affine (folded BN1; the pad
    with zeros happens AFTER it, matching torch), folded post-conv BN affine, activation and
    fused residual add all run inside the Pallas matmul epilogue."""
    k, _, cin, cout = w.shape
    if pre_scale is not None:
        x = x.astype(jnp.float32) * pre_scale + pre_shift
    x = x.astype(jnp.bfloat16)
    res2 = None if residual is None else residual.reshape(-1, cout)
    if k == 1 and pad == 0:
        xs = x[:, ::stride, ::stride, :]
        NB, oh, ow, _ = xs.shape
        y = matmul_fused(xs.reshape(NB * oh * ow, cin), w.reshape(cin, cout),
                         scale, shift, alpha, act, residual=res2, out_dtype=out_dtype)
    else:
        # TODO(synk): replace im2col with a tap-fused conv (halo-window DMAs over padded x).
        patches, (NB, oh, ow) = _im2col(x, k, stride, pad)
        y = matmul_fused(patches, w.reshape(k * k * cin, cout),
                         scale, shift, alpha, act, residual=res2, out_dtype=out_dtype)
    return y.reshape(NB, oh, ow, cout)


# ----------------------------- FPN merge: bilinear upsample (XLA, tiny) + fused 1x1 conv/add -----------------------------

def _interp_matrix(out_size, in_size):
    A = np.zeros((out_size, in_size), np.float32)
    for i in range(out_size):
        src = 0.0 if out_size == 1 else i * (in_size - 1) / (out_size - 1)
        i0 = min(int(math.floor(src)), in_size - 1)
        i1 = min(i0 + 1, in_size - 1)
        f = src - i0
        A[i, i0] += 1.0 - f
        A[i, i1] += f
    return jnp.asarray(A)


def upsample_bilinear_ac(x, out_h, out_w):
    NB, h, w, C = x.shape
    Ah = _interp_matrix(out_h, h)
    Aw = _interp_matrix(out_w, w)
    xf = x.astype(jnp.float32)
    y = jnp.einsum("Hh,nhwc->nHwc", Ah, xf)
    z = jnp.einsum("Ww,nHwc->nHWc", Aw, y)
    return z


@jax.jit
def fpn_merge(low, high, w, b):
    """p = bilinear_upsample(low -> size(high), align_corners=True) + conv1x1(high) + bias.
    The add rides the 1x1-conv epilogue as a fused residual operand."""
    NB, H, W, C = high.shape
    up = upsample_bilinear_ac(low, H, W)
    return conv2d(high, w, stride=1, pad=0, shift=b, residual=up)


# ----------------------------- batched / grouped GradualStyleBlocks -----------------------------

@functools.partial(jax.jit, static_argnames=("n",))
def _style_head(x, w0, b0, n):
    """First 3x3/s2 conv of all styles at one pyramid level, batched along Cout."""
    C = w0.shape[1] // n
    patches, (NB, oh, ow) = _im2col(x.astype(jnp.bfloat16), 3, 2, 1)
    y = matmul_fused(patches, w0, shift=b0, act="lrelu")          # (NB*oh*ow, n*C) bf16
    y = y.reshape(NB, oh, ow, n, C)
    return jnp.transpose(y, (3, 0, 1, 2, 4))                      # (n, NB, oh, ow, C)


@jax.jit
def grouped_conv3x3_s2(y, wg, bg):
    """y: (G, NB, H, W, C); wg: (G, 9*C, C); bg: (G, C).  Conv3x3/s2/p1 + LeakyReLU per group."""
    G, NB, H, W, C = y.shape
    y = y.astype(jnp.bfloat16)
    yp = jnp.pad(y, ((0, 0), (0, 0), (1, 1), (1, 1), (0, 0)))
    oh = (H + 2 - 3) // 2 + 1
    ow = (W + 2 - 3) // 2 + 1
    cols = []
    for kh in range(3):
        for kw in range(3):
            cols.append(yp[:, :, kh:kh + 2 * (oh - 1) + 1:2,
                           kw:kw + 2 * (ow - 1) + 1:2, :])
    patches = jnp.concatenate(cols, axis=-1).reshape(G, NB * oh * ow, 9 * C)
    out = matmul_fused(patches, wg, shift=bg, act="lrelu")        # (G, NB*oh*ow, C) bf16
    return out.reshape(G, NB, oh, ow, C)


def style_level_forward(x, style_ps):
    """Run all GradualStyleBlocks that read feature map `x`; returns (n_styles, NB, 512) f32."""
    n = len(style_ps)
    C = style_ps[0]["out_c"]
    K9 = 9 * C
    # first conv: concat weights along Cout, shared im2col patches
    w0 = jnp.concatenate([p["convs"][0][0].reshape(K9, C) for p in style_ps], axis=1)
    b0 = jnp.concatenate([p["convs"][0][1] for p in style_ps], axis=0)
    y = _style_head(x, w0, b0, n)                                 # (n, NB, oh, ow, C)
    # remaining convs: grouped across styles (leading grid axis = style index)
    nconv = len(style_ps[0]["convs"])
    for ci in range(1, nconv):
        wg = jnp.stack([p["convs"][ci][0] for p in style_ps]).reshape(n, K9, C)
        bg = jnp.stack([p["convs"][ci][1] for p in style_ps])
        y = grouped_conv3x3_s2(y, wg, bg)
    # linear heads, grouped; final latents stay fp32
    lw = jnp.stack([p["lin_w"] for p in style_ps])                # (n, C, C)
    lb = jnp.stack([p["lin_b"] for p in style_ps])                # (n, C)
    G, NB2, oh, ow, _ = y.shape
    feats = y.reshape(G, NB2 * oh * ow, C)                        # view(-1, out_c) per style
    return matmul_fused(feats, lw, shift=lb, out_dtype=jnp.float32)


# ----------------------------- parameters (deterministic, synthetic) -----------------------------

class ParamGen:
    def __init__(self, key):
        self.key = key
        self.n = 0

    def _next(self):
        self.n += 1
        return jax.random.fold_in(self.key, self.n)

    def normal(self, shape, std):
        return jax.random.normal(self._next(), shape, jnp.float32) * std

    def conv_w(self, k, cin, cout):
        return self.normal((k, k, cin, cout), 1.0 / math.sqrt(k * k * cin))

    def bn(self, c):
        return dict(gamma=jnp.ones((c,), jnp.float32),
                    beta=self.normal((c,), 0.01),
                    mean=self.normal((c,), 0.01),
                    var=jnp.ones((c,), jnp.float32))


def bn_affine(p, eps=1e-5):
    scale = p["gamma"] / jnp.sqrt(p["var"] + eps)
    shift = p["beta"] - p["mean"] * scale
    return scale, shift


def get_blocks_50():
    def block(in_c, depth, num_units, stride=2):
        return [(in_c, depth, stride)] + [(depth, depth, 1)] * (num_units - 1)
    cfg = []
    cfg += block(64, 64, 3)
    cfg += block(64, 128, 4)
    cfg += block(128, 256, 14)
    cfg += block(256, 512, 3)
    return cfg


def make_bottleneck_params(pg, in_c, depth, stride):
    p = dict(in_c=in_c, depth=depth, stride=stride)
    if in_c != depth:
        p["sc_w"] = pg.conv_w(1, in_c, depth)
        p["sc_bn"] = pg.bn(depth)
    p["bn1"] = pg.bn(in_c)
    p["conv1_w"] = pg.conv_w(3, in_c, depth)
    p["prelu"] = jnp.full((depth,), 0.25, jnp.float32)
    p["conv2_w"] = pg.conv_w(3, depth, depth)
    p["bn2"] = pg.bn(depth)
    p["se_fc1"] = pg.conv_w(1, depth, depth // 16)
    p["se_fc2"] = pg.conv_w(1, depth // 16, depth)
    return p


def make_encoder_params(key, stylegan_size=1024):
    pg = ParamGen(key)
    P = {}
    P["in_conv"] = pg.conv_w(3, 3, 64)
    P["in_bn"] = pg.bn(64)
    P["in_prelu"] = jnp.full((64,), 0.25, jnp.float32)
    P["body"] = [make_bottleneck_params(pg, ic, d, s) for (ic, d, s) in get_blocks_50()]

    log_size = int(math.log(stylegan_size, 2))
    P["style_count"] = 2 * log_size - 2     # 18
    P["coarse_ind"] = 3
    P["middle_ind"] = 7
    styles = []
    for i in range(P["style_count"]):
        spatial = 16 if i < P["coarse_ind"] else (32 if i < P["middle_ind"] else 64)
        num_pools = int(math.log2(spatial))
        convs = [(pg.conv_w(3, 512, 512), pg.normal((512,), 0.01)) for _ in range(num_pools)]
        styles.append(dict(convs=convs, out_c=512,
                           lin_w=pg.normal((512, 512), 1.0 / math.sqrt(512)),
                           lin_b=pg.normal((512,), 0.01)))
    P["styles"] = styles
    P["lat1_w"] = pg.conv_w(1, 256, 512)
    P["lat1_b"] = pg.normal((512,), 0.01)
    P["lat2_w"] = pg.conv_w(1, 128, 512)
    P["lat2_b"] = pg.normal((512,), 0.01)
    return P


# ----------------------------- forward pass -----------------------------

def bottleneck_ir_se_forward(x, p):
    stride = p["stride"]
    depth = p["depth"]
    # shortcut
    if p["in_c"] == depth:
        shortcut = x if stride == 1 else x[:, ::stride, ::stride, :]   # MaxPool2d(1, stride)
    else:
        s, b = bn_affine(p["sc_bn"])
        shortcut = conv2d(x, p["sc_w"], stride=stride, pad=0, scale=s, shift=b)
    # res layer: BN1 (folded into conv1 glue) -> conv3x3 -> PReLU -> conv3x3(stride) -> BN2 -> SE
    s1, b1 = bn_affine(p["bn1"])
    r = conv2d(x, p["conv1_w"], stride=1, pad=1, alpha=p["prelu"], act="prelu",
               pre_scale=s1, pre_shift=b1)
    s2, b2 = bn_affine(p["bn2"])
    r = conv2d(r, p["conv2_w"], stride=stride, pad=1, scale=s2, shift=b2)
    NB2, oh, ow, D = r.shape
    out = se_residual(r.reshape(NB2, oh * ow, D),
                      shortcut.reshape(NB2, oh * ow, D),
                      p["se_fc1"].reshape(D, D // 16),
                      p["se_fc2"].reshape(D // 16, D))
    return out.reshape(NB2, oh, ow, D)


def gradual_style_encoder_forward(x_nchw, P):
    # NOTE: a single whole-model jax.jit can be layered on top of this function for production;
    # here the per-shape jit wrappers already fuse the glue around each Pallas call and keep the
    # sandbox compile time bounded.
    x = jnp.transpose(x_nchw, (0, 2, 3, 1)).astype(jnp.float32)   # NCHW -> NHWC
    s, b = bn_affine(P["in_bn"])
    x = conv2d(x, P["in_conv"], stride=1, pad=1, scale=s, shift=b,
               alpha=P["in_prelu"], act="prelu")
    c1 = c2 = c3 = None
    for i, bp in enumerate(P["body"]):
        x = bottleneck_ir_se_forward(x, bp)
        if i == 6:
            c1 = x
        elif i == 20:
            c2 = x
        elif i == 23:
            c3 = x
    p2 = fpn_merge(c3, c2, P["lat1_w"], P["lat1_b"])              # upsample(c3) + lat1(c2)
    p1 = fpn_merge(p2, c1, P["lat2_w"], P["lat2_b"])              # upsample(p2) + lat2(c1)

    lat_c = style_level_forward(c3, P["styles"][:P["coarse_ind"]])                  # (3, NB, 512)
    lat_m = style_level_forward(p2, P["styles"][P["coarse_ind"]:P["middle_ind"]])   # (4, NB, 512)
    lat_f = style_level_forward(p1, P["styles"][P["middle_ind"]:])                  # (11, NB, 512)
    out = jnp.concatenate([lat_c, lat_m, lat_f], axis=0)                            # (18, NB, 512)
    return jnp.transpose(out, (1, 0, 2)).astype(jnp.float32)                        # (NB, 18, 512)


# ----------------------------- main -----------------------------

if __name__ == "__main__":
    key = jax.random.PRNGKey(0)
    k_in, k_par = jax.random.split(key)
    # Small-but-valid input: NCHW (2, 3, 64, 64)  ->  c1 16x16/128, c2 8x8/256, c3 4x4/512
    x = jax.random.normal(k_in, (2, 3, 64, 64), jnp.float32)

    params = make_encoder_params(k_par, stylegan_size=1024)
    out = gradual_style_encoder_forward(x, params)
    out = jax.block_until_ready(out)

    assert out.shape == (2, 18, 512), out.shape
    assert bool(jnp.all(jnp.isfinite(out)))
    print("KERNEL_OK")
</pallas_src>

<mosaic_0001>
module attributes {stable_mosaic.version = 11 : i64} {
  func.func @kernel(%arg0: i32, %arg1: i32, %arg2: i32, %arg3: i32, %arg4: memref<1x512x27xbf16, #tpu.memory_space<vmem>>, %arg5: memref<1x27x64xbf16, #tpu.memory_space<vmem>>, %arg6: memref<1x1x64xf32, #tpu.memory_space<vmem>>, %arg7: memref<1x1x64xf32, #tpu.memory_space<vmem>>, %arg8: memref<1x1x64xf32, #tpu.memory_space<vmem>>, %arg9: memref<1x512x64xbf16, #tpu.memory_space<vmem>>, %arg10: memref<512x64xf32, #tpu.memory_space<vmem>>) attributes {dimension_semantics = [#tpu.dimension_semantics<parallel>, #tpu.dimension_semantics<parallel>, #tpu.dimension_semantics<parallel>, #tpu.dimension_semantics<arbitrary>], iteration_bounds = array<i64: 1, 16, 1, 1>, scalar_prefetch = 0 : i64, scratch_operands = 1 : i64, tpu.core_type = #tpu.core_type<tc>, window_params = [{transform_indices = @transform_0, window_bounds = array<i64: 1, 512, 27>}, {transform_indices = @transform_1, window_bounds = array<i64: 1, 27, 64>}, {transform_indices = @transform_2, window_bounds = array<i64: 1, 1, 64>}, {transform_indices = @transform_3, window_bounds = array<i64: 1, 1, 64>}, {transform_indices = @transform_4, window_bounds = array<i64: 1, 1, 64>}, {transform_indices = @transform_5, window_bounds = array<i64: 1, 512, 64>}]} {
    %c0 = arith.constant 0 : index
    %c0_0 = arith.constant 0 : index
    %c0_1 = arith.constant 0 : index
    %0 = vector.load %arg4[%c0, %c0_0, %c0_1] : memref<1x512x27xbf16, #tpu.memory_space<vmem>>, vector<1x512x27xbf16>
    %1 = vector.shape_cast %0 : vector<1x512x27xbf16> to vector<512x27xbf16>
    %c0_2 = arith.constant 0 : index
    %c0_3 = arith.constant 0 : index
    %c0_4 = arith.constant 0 : index
    %2 = vector.load %arg5[%c0_2, %c0_3, %c0_4] : memref<1x27x64xbf16, #tpu.memory_space<vmem>>, vector<1x27x64xbf16>
    %3 = vector.shape_cast %2 : vector<1x27x64xbf16> to vector<27x64xbf16>
    %cst = arith.constant dense<0.000000e+00> : vector<512x64xf32>
    %4 = tpu.matmul %1, %3, %cst {dimension_numbers = #tpu.dot_dimension_numbers<[1], [0], [0], [1], [0, 0, 1, 1], [], []>} : vector<512x27xbf16>, vector<27x64xbf16>, vector<512x64xf32> -> vector<512x64xf32>
    %c0_i32 = arith.constant 0 : i32
    %5 = arith.cmpi eq, %arg3, %c0_i32 : i32
    %6 = arith.extui %5 : i1 to i32
    %c0_i32_5 = arith.constant 0 : i32
    %7 = arith.cmpi ne, %6, %c0_i32_5 : i32
    scf.if %7 {
      %c0_10 = arith.constant 0 : index
      %c0_11 = arith.constant 0 : index
      %14 = vector.load %arg10[%c0_10, %c0_11] : memref<512x64xf32, #tpu.memory_space<vmem>>, vector<512x64xf32>
      tpu.vector_store %arg10[%c0_10, %c0_11], %4 {strides = array<i32>} : memref<512x64xf32, #tpu.memory_space<vmem>>, vector<512x64xf32>,
    } else {
    }
    %c0_i32_6 = arith.constant 0 : i32
    %8 = arith.cmpi ne, %arg3, %c0_i32_6 : i32
    %9 = arith.extui %8 : i1 to i32
    %c0_i32_7 = arith.constant 0 : i32
    %10 = arith.cmpi ne, %9, %c0_i32_7 : i32
    scf.if %10 {
      %c0_10 = arith.constant 0 : index
      %c0_11 = arith.constant 0 : index
      %14 = vector.load %arg10[%c0_10, %c0_11] : memref<512x64xf32, #tpu.memory_space<vmem>>, vector<512x64xf32>
      %15 = arith.addf %14, %4 : vector<512x64xf32>
      %c0_12 = arith.constant 0 : index
      %c0_13 = arith.constant 0 : index
      %16 = vector.load %arg10[%c0_12, %c0_13] : memref<512x64xf32, #tpu.memory_space<vmem>>, vector<512x64xf32>
      tpu.vector_store %arg10[%c0_12, %c0_13], %15 {strides = array<i32>} : memref<512x64xf32, #tpu.memory_space<vmem>>, vector<512x64xf32>,
    } else {
    }
    %c0_i32_8 = arith.constant 0 : i32
    %11 = arith.cmpi eq, %arg3, %c0_i32_8 : i32
    %12 = arith.extui %11 : i1 to i32
    %c0_i32_9 = arith.constant 0 : i32
    %13 = arith.cmpi ne, %12, %c0_i32_9 : i32
    scf.if %13 {
      %c0_10 = arith.constant 0 : index
      %c0_11 = arith.constant 0 : index
      %14 = vector.load %arg10[%c0_10, %c0_11] : memref<512x64xf32, #tpu.memory_space<vmem>>, vector<512x64xf32>
      %c0_12 = arith.constant 0 : index
      %c0_13 = arith.constant 0 : index
      %c0_14 = arith.constant 0 : index
      %15 = vector.load %arg6[%c0_12, %c0_13, %c0_14] : memref<1x1x64xf32, #tpu.memory_space<vmem>>, vector<1x1x64xf32>
      %16 = vector.shape_cast %15 : vector<1x1x64xf32> to vector<1x64xf32>
      %17 = vector.broadcast %16 : vector<1x64xf32> to vector<512x64xf32>
      %18 = arith.mulf %14, %17 : vector<512x64xf32>
      %c0_15 = arith.constant 0 : index
      %c0_16 = arith.constant 0 : index
      %c0_17 = arith.constant 0 : index
      %19 = vector.load %arg7[%c0_15, %c0_16, %c0_17] : memref<1x1x64xf32, #tpu.memory_space<vmem>>, vector<1x1x64xf32>
      %20 = vector.shape_cast %19 : vector<1x1x64xf32> to vector<1x64xf32>
      %21 = vector.broadcast %20 : vector<1x64xf32> to vector<512x64xf32>
      %22 = arith.addf %18, %21 : vector<512x64xf32>
      %cst_18 = arith.constant 0.000000e+00 : f32
      %23 = vector.broadcast %cst_18 : f32 to vector<512x64xf32>
      %24 = arith.cmpf oge, %22, %23 : vector<512x64xf32>
      %c0_19 = arith.constant 0 : index
      %c0_20 = arith.constant 0 : index
      %c0_21 = arith.constant 0 : index
      %25 = vector.load %arg8[%c0_19, %c0_20, %c0_21] : memref<1x1x64xf32, #tpu.memory_space<vmem>>, vector<1x1x64xf32>
      %26 = vector.shape_cast %25 : vector<1x1x64xf32> to vector<1x64xf32>
      %27 = vector.broadcast %26 : vector<1x64xf32> to vector<512x64xf32>
      %28 = arith.mulf %22, %27 : vector<512x64xf32>
      %29 = arith.select %24, %22, %28 : vector<512x64xi1>, vector<512x64xf32>
      %30 = arith.truncf %29 : vector<512x64xf32> to vector<512x64xbf16>
      %c0_22 = arith.constant 0 : index
      %c0_23 = arith.constant 0 : index
      %c0_24 = arith.constant 0 : index
      %31 = vector.load %arg9[%c0_22, %c0_23, %c0_24] : memref<1x512x64xbf16, #tpu.memory_space<vmem>>, vector<1x512x64xbf16>
      %32 = vector.shape_cast %31 : vector<1x512x64xbf16> to vector<512x64xbf16>
      %33 = vector.shape_cast %30 : vector<512x64xbf16> to vector<1x512x64xbf16>
      tpu.vector_store %arg9[%c0_22, %c0_23, %c0_24], %33 {strides = array<i32>} : memref<1x512x64xbf16, #tpu.memory_space<vmem>>, vector<1x512x64xbf16>,
    } else {
    }
    return
  }
  func.func @transform_0(%arg0: i32, %arg1: i32, %arg2: i32, %arg3: i32) -> (i32, i32, i32) {
    %c0_i32 = arith.constant 0 : i32
    return %arg0, %arg1, %arg3 : i32, i32, i32
  }
  func.func @transform_1(%arg0: i32, %arg1: i32, %arg2: i32, %arg3: i32) -> (i32, i32, i32) {
    %c0_i32 = arith.constant 0 : i32
    return %arg0, %arg3, %arg2 : i32, i32, i32
  }
  func.func @transform_2(%arg0: i32, %arg1: i32, %arg2: i32, %arg3: i32) -> (i32, i32, i32) {
    %c0_i32 = arith.constant 0 : i32
    %c0_i32_0 = arith.constant 0 : i32
    return %arg0, %c0_i32, %arg2 : i32, i32, i32
  }
  func.func @transform_3(%arg0: i32, %arg1: i32, %arg2: i32, %arg3: i32) -> (i32, i32, i32) {
    %c0_i32 = arith.constant 0 : i32
    %c0_i32_0 = arith.constant 0 : i32
    return %arg0, %c0_i32, %arg2 : i32, i32, i32
  }
  func.func @transform_4(%arg0: i32, %arg1: i32, %arg2: i32, %arg3: i32) -> (i32, i32, i32) {
    %c0_i32 = arith.constant 0 : i32
    %c0_i32_0 = arith.constant 0 : i32
    return %arg0, %c0_i32, %arg2 : i32, i32, i32
  }
  func.func @transform_5(%arg0: i32, %arg1: i32, %arg2: i32, %arg3: i32) -> (i32, i32, i32) {
    %c0_i32 = arith.constant 0 : i32
    return %arg0, %arg1, %arg2 : i32, i32, i32
  }
}

</mosaic_0001>

<bundles_post_ra>
// kernel: tpu_custom_call.1
= control target key start
LH: loop header
LB: loop body
LE: loop exit
PB: predicated region body
PF: predicated region fallthrough
CT: control target
= control target key end

     0   :  { %s2210_s18 = smov 0   ;;  %s2212_s19 = smov 0   ;;  %s2742_s0 = inlined_call_operand.vmem [shape: bf16[1,8192,27], index: 0, kind: input, shape index: {}]   ;;  %s2743_s1 = inlined_call_operand.vmem [shape: bf16[1,27,64], index: 1, kind: input, shape index: {}]   ;;  %s2744_s2 = inlined_call_operand.vmem [shape: f32[1,1,64], index: 2, kind: input, shape index: {}]   ;;  %s2745_s3 = inlined_call_operand.vmem [shape: f32[1,1,64], index: 3, kind: input, shape index: {}]   ;;  %s2746_s4 = inlined_call_operand.vmem [shape: f32[1,1,64], index: 4, kind: input, shape index: {}]   ;;  %s2747_s5 = inlined_call_operand.vmem [shape: bf16[1,8192,64], index: 5, kind: output, shape index: {}]  }
   0x1   :  { %s2214_s20 = smov 0  }
   0x2 LB: > { %s37_s21 = sadd.s32 1, %s2173_s19  ;;  %p1909_p0 = scmp.ge.s32.totalorder %s2177_s20, 1  ;;  %s2177_s20 = sphi %s2214_s20, %s15_s20   ;;  %s2173_s19 = sphi %s2212_s19, %s2749_s19   ;;  %s2169_s18 = sphi %s2210_s18, %s2748_s18  }
   0x3   : > { %p39_p1 = scmp.ge.s32.totalorder %s37_s21, 16  ;;  %p290_p2 = scmp.lt.s32.totalorder %s2177_s20, 17 }
   0x5   : > { %s2751_s21 = smov (%p39_p1, %s37_s21), 0  ;;  %p291_p3 = pnand %p1909_p0, %p290_p2 }
   0x6   : > { %s1910_s26 = sshll.u32 (!%p291_p3), %s2169_s18, 6 }
   0x7   : > { %294 = sbr.rel (%p291_p3) target bundleno = 301 (0x12d), region = 40  ;;  %p365_p4 = scmp.lt.s32.totalorder (!%p291_p3), %s1910_s26, 1023 }
   0xc   : > { %v2048_v0 = vld [vmem:[%s2743_s1 + $0x8] sm:$0xf]  ;;  %v2117_v1 = vld [vmem:[%s2743_s1 + $0x8] sm:$0x30]  ;;  %vm756_vm0 = vcmask 1044480   ;;  %vm757_vm1 = vcmask 1045504  }
   0xd   : > { %v2049_v2 = vor.u32 %v2117_v1, %v2048_v0  ;;  %v2179_v3 = vmov 65535   ;;  %s2753_s26 = smov (!%p365_p4, %s1910_s26), 1023  ;;  %v2116_v7 = vld [vmem:[%s2743_s1] sm:$0xff]  ;;  %vm659_vm2 = vcmask 220160   ;;  %vm936_vm3 = vcmask 523264  }
   0xe   : > { %v758_v4 = vsel %vm756_vm0, 4294967295, %v2179_v3  ;;  %s1911_s29 = sshll.u32 %s2753_s26, 2  ;;  %v2316_v42 = vld [vmem:[%s2744_s2] ss:$0 sm:$0xff]  ;;  %vm1661_vm6 = vcmask 519168  }
   0xf   : > { %v759_v5 = vsel %vm757_vm1, %v758_v4, 0  ;;  %s2245_s7 = scalar_lea.vmem %s2742_s0, %s1911_s29  ;;  %v2321_v43 = vld [vmem:[%s2745_s3] ss:$0 sm:$0xff]  ;;  %s2343_s16 = scalar_lea.vmem %s2747_s5, %s1911_s29 }
  0x10   : > { %v761_v6 = vand.u32 %v2049_v2, %v759_v5  ;;  %v2084_v8 = vld [vmem:[%s2245_s7] sm:$0xff]  ;;  %v2085_v12 = vld [vmem:[%s2245_s7 + $0x8] sm:$0xff]  ;;  %v2086_v16 = vld [vmem:[%s2245_s7 + $0x10] sm:$0xff] }
  0x11   : > { %v2092_v9 = vld [vmem:[%s2245_s7 + $0x40] sm:$0xff]  ;;  %v2093_v13 = vld [vmem:[%s2245_s7 + $0x48] sm:$0xff]  ;;  %v2094_v17 = vld [vmem:[%s2245_s7 + $0x50] sm:$0xff] }
  0x12   : > { %769 = vmatpush.bf16.msra.mxu0 %v761_v6  ;;  %2118 = vmatpush.bf16.msra.mxu1 %v761_v6  ;;  %v2100_v10 = vld [vmem:[%s2245_s7 + $0x80] sm:$0xff]  ;;  %v2101_v14 = vld [vmem:[%s2245_s7 + $0x88] sm:$0xff]  ;;  %v2102_v18 = vld [vmem:[%s2245_s7 + $0x90] sm:$0xff] }
  0x13   : > { %2119 = vmatpush.bf16.msra.mxu2 %v761_v6  ;;  %2120 = vmatpush.bf16.msra.mxu3 %v761_v6  ;;  %v2108_v11 = vld [vmem:[%s2245_s7 + $0xc0] sm:$0xff]  ;;  %v2109_v15 = vld [vmem:[%s2245_s7 + $0xc8] sm:$0xff]  ;;  %v2110_v19 = vld [vmem:[%s2245_s7 + $0xd0] sm:$0xff] }
  0x14   : > { %v2087_v20 = vld [vmem:[%s2245_s7 + $0x18] sm:$0xff]  ;;  %v2088_v24 = vld [vmem:[%s2245_s7 + $0x20] sm:$0xff]  ;;  %v2089_v28 = vld [vmem:[%s2245_s7 + $0x28] sm:$0xff] }
  0x15   : > { %v2095_v21 = vld [vmem:[%s2245_s7 + $0x58] sm:$0xff]  ;;  %v2096_v25 = vld [vmem:[%s2245_s7 + $0x60] sm:$0xff]  ;;  %v2097_v29 = vld [vmem:[%s2245_s7 + $0x68] sm:$0xff] }
  0x16   : > { %770 = vmatpush.bf16.msra.mxu0 %v2116_v7  ;;  %2121 = vmatpush.bf16.msra.mxu1 %v2116_v7  ;;  %v2103_v22 = vld [vmem:[%s2245_s7 + $0x98] sm:$0xff]  ;;  %v2104_v26 = vld [vmem:[%s2245_s7 + $0xa0] sm:$0xff]  ;;  %v2105_v30 = vld [vmem:[%s2245_s7 + $0xa8] sm:$0xff] }
  0x17   : > { %2122 = vmatpush.bf16.msra.mxu2 %v2116_v7  ;;  %2123 = vmatpush.bf16.msra.mxu3 %v2116_v7  ;;  %v2111_v23 = vld [vmem:[%s2245_s7 + $0xd8] sm:$0xff]  ;;  %v2112_v27 = vld [vmem:[%s2245_s7 + $0xe0] sm:$0xff]  ;;  %v2113_v31 = vld [vmem:[%s2245_s7 + $0xe8] sm:$0xff] }
  0x18   : > { %v2090_v32 = vld [vmem:[%s2245_s7 + $0x30] sm:$0xff]  ;;  %v2091_v36 = vld [vmem:[%s2245_s7 + $0x38] sm:$0xff]  ;;  %v2328_v50 = vld [vmem:[%s2746_s4] ss:$0 sm:$0xff] }
  0x19   : > { %2050 = vmatmul.msk.bf16.vlgmr.msra.gmra.mxu0 %vm659_vm2, %v2084_v8  ;;  %2058 = vmatmul.msk.bf16.vlgmr.msra.gmra.mxu1 %vm659_vm2, %v2092_v9  ;;  %v2098_v33 = vld [vmem:[%s2245_s7 + $0x70] sm:$0xff]  ;;  %v2099_v37 = vld [vmem:[%s2245_s7 + $0x78] sm:$0xff] }
  0x1a   : > { %2066 = vmatmul.msk.bf16.vlgmr.msra.gmra.mxu2 %vm659_vm2, %v2100_v10  ;;  %2074 = vmatmul.msk.bf16.vlgmr.msra.gmra.mxu3 %vm659_vm2, %v2108_v11  ;;  %v2106_v34 = vld [vmem:[%s2245_s7 + $0xb0] sm:$0xff]  ;;  %v2107_v38 = vld [vmem:[%s2245_s7 + $0xb8] sm:$0xff] }
  0x1b   : > { %v2114_v35 = vld [vmem:[%s2245_s7 + $0xf0] sm:$0xff]  ;;  %v2115_v39 = vld [vmem:[%s2245_s7 + $0xf8] sm:$0xff] }
  0x29   : > { %2051 = vmatmul.msk.bf16.gmra.mxu0 %vm659_vm2, %v2085_v12  ;;  %2059 = vmatmul.msk.bf16.gmra.mxu1 %vm659_vm2, %v2093_v13 }
  0x2a   : > { %2067 = vmatmul.msk.bf16.gmra.mxu2 %vm659_vm2, %v2101_v14  ;;  %2075 = vmatmul.msk.bf16.gmra.mxu3 %vm659_vm2, %v2109_v15 }
  0x39   : > { %2052 = vmatmul.msk.bf16.gmra.mxu0 %vm659_vm2, %v2086_v16  ;;  %2060 = vmatmul.msk.bf16.gmra.mxu1 %vm659_vm2, %v2094_v17 }
  0x3a   : > { %2068 = vmatmul.msk.bf16.gmra.mxu2 %vm659_vm2, %v2102_v18  ;;  %2076 = vmatmul.msk.bf16.gmra.mxu3 %vm659_vm2, %v2110_v19 }
  0x49   : > { %2053 = vmatmul.msk.bf16.gmra.mxu0 %vm659_vm2, %v2087_v20  ;;  %2061 = vmatmul.msk.bf16.gmra.mxu1 %vm659_vm2, %v2095_v21 }
  0x4a   : > { %2069 = vmatmul.msk.bf16.gmra.mxu2 %vm659_vm2, %v2103_v22  ;;  %2077 = vmatmul.msk.bf16.gmra.mxu3 %vm659_vm2, %v2111_v23 }
  0x59   : > { %2054 = vmatmul.msk.bf16.gmra.mxu0 %vm659_vm2, %v2088_v24  ;;  %2062 = vmatmul.msk.bf16.gmra.mxu1 %vm659_vm2, %v2096_v25 }
  0x5a   : > { %2070 = vmatmul.msk.bf16.gmra.mxu2 %vm659_vm2, %v2104_v26  ;;  %2078 = vmatmul.msk.bf16.gmra.mxu3 %vm659_vm2, %v2112_v27 }
  0x69   : > { %2055 = vmatmul.msk.bf16.gmra.mxu0 %vm659_vm2, %v2089_v28  ;;  %2063 = vmatmul.msk.bf16.gmra.mxu1 %vm659_vm2, %v2097_v29 }
  0x6a   : > { %2071 = vmatmul.msk.bf16.gmra.mxu2 %vm659_vm2, %v2105_v30  ;;  %2079 = vmatmul.msk.bf16.gmra.mxu3 %vm659_vm2, %v2113_v31 }
  0x79   : > { %2056 = vmatmul.msk.bf16.gmra.mxu0 %vm659_vm2, %v2090_v32  ;;  %2064 = vmatmul.msk.bf16.gmra.mxu1 %vm659_vm2, %v2098_v33 }
  0x7a   : > { %2072 = vmatmul.msk.bf16.gmra.mxu2 %vm659_vm2, %v2106_v34  ;;  %2080 = vmatmul.msk.bf16.gmra.mxu3 %vm659_vm2, %v2114_v35 }
  0x89   : > { %2057 = vmatmul.msk.bf16.gmra.mxu0 %vm659_vm2, %v2091_v36  ;;  %2065 = vmatmul.msk.bf16.gmra.mxu1 %vm659_vm2, %v2099_v37 }
  0x8a   : > { %2073 = vmatmul.msk.bf16.gmra.mxu2 %vm659_vm2, %v2107_v38  ;;  %2081 = vmatmul.msk.bf16.gmra.mxu3 %vm659_vm2, %v2115_v39 }
  0x96   : > { %v772_v40 = vpop.f32.mrf.mxu0  ;;  %v812_v41 = vpop.f32.mrf.mxu1 }
  0x97   : > { %937 = vst.msk [vmem:[#allocation2] sm:$0xff] %vm936_vm3, %v772_v40 }
  0x98   : > { %953 = vst.msk [vmem:[#allocation2 + $0x80] sm:$0xff] %vm936_vm3, %v812_v41 }
  0x9d   : > { %v852_v44 = vpop.f32.mrf.mxu2  ;;  %v892_v45 = vpop.f32.mrf.mxu3 }
  0x9e   : > { %v1201_v46 = vld [vmem:[#allocation2] sm:$0xff]  ;;  %969 = vst.msk [vmem:[#allocation2 + $0x100] sm:$0xff] %vm936_vm3, %v852_v44  ;;  %v774_v47 = vpop.f32.mrf.mxu0  ;;  %v814_v48 = vpop.f32.mrf.mxu1 }
  0x9f   : > { %v1269_v49 = vmul.f32 %v2316_v42, %v1201_v46  ;;  %v1217_v51 = vld [vmem:[#allocation2 + $0x80] sm:$0xff]  ;;  %985 = vst.msk [vmem:[#allocation2 + $0x180] sm:$0xff] %vm936_vm3, %v892_v45 }
  0xa0   : > { %v1285_v52 = vmul.f32 %v2316_v42, %v1217_v51  ;;  %938 = vst.msk [vmem:[#allocation2 + $0x8] sm:$0xff] %vm936_vm3, %v774_v47 }
  0xa1   : > { %v1337_v53 = vadd.f32 %v2321_v43, %v1269_v49  ;;  %954 = vst.msk [vmem:[#allocation2 + $0x88] sm:$0xff] %vm936_vm3, %v814_v48 }
  0xa2   : > { %v1353_v54 = vadd.f32 %v2321_v43, %v1285_v52 }
  0xa3   : > { %vm1401_vm4 = vcmp.ge.f32.partialorder %v1337_v53, 0.0  ;;  %v1469_v55 = vmul.f32 %v2328_v50, %v1337_v53 }
  0xa4   : > { %vm1417_vm5 = vcmp.ge.f32.partialorder %v1353_v54, 0.0  ;;  %v1485_v56 = vmul.f32 %v2328_v50, %v1353_v54 }
  0xa5   : > { %v1533_v57 = vsel %vm1401_vm4, %v1337_v53, %v1469_v55  ;;  %v1233_v58 = vld [vmem:[#allocation2 + $0x100] sm:$0xff]  ;;  %v854_v59 = vpop.f32.mrf.mxu2  ;;  %v894_v60 = vpop.f32.mrf.mxu3 }
  0xa6   : > { %v1597_v61 = vpack.c.bf16 %v1533_v57, %v1533_v57  ;;  %v1549_v62 = vsel %vm1417_vm5, %v1353_v54, %v1485_v56  ;;  %v1301_v63 = vmul.f32 %v2316_v42, %v1233_v58  ;;  %v1249_v0 = vld [vmem:[#allocation2 + $0x180] sm:$0xff]  ;;  %970 = vst.msk [vmem:[#allocation2 + $0x108] sm:$0xff] %vm936_vm3, %v854_v59  ;;  %v777_v1 = vpop.f32.mrf.mxu0  ;;  %v817_v2 = vpop.f32.mrf.mxu1 }
  0xa7   : > { %v1613_v3 = vpack.c.bf16 %v1549_v62, %v1549_v62  ;;  %v1317_v4 = vmul.f32 %v2316_v42, %v1249_v0  ;;  %v1202_v5 = vld [vmem:[#allocation2 + $0x8] sm:$0xff]  ;;  %986 = vst.msk [vmem:[#allocation2 + $0x188] sm:$0xff] %vm936_vm3, %v894_v60 }
  0xa8   : > { %1662 = vst.msk [vmem:[%s2343_s16] sm:$0xf] %vm1661_vm6, %v1597_v61  ;;  %v1369_v6 = vadd.f32 %v2321_v43, %v1301_v63  ;;  %v1270_v7 = vmul.f32 %v2316_v42, %v1202_v5  ;;  %v1218_v8 = vld [vmem:[#allocation2 + $0x88] sm:$0xff] }
  0xa9   : > { %1678 = vst.msk [vmem:[%s2343_s16 + $0x40] sm:$0xf] %vm1661_vm6, %v1613_v3  ;;  %v1385_v9 = vadd.f32 %v2321_v43, %v1317_v4  ;;  %v1286_v10 = vmul.f32 %v2316_v42, %v1218_v8 }
  0xaa   : > { %vm1433_vm7 = vcmp.ge.f32.partialorder %v1369_v6, 0.0  ;;  %v1501_v11 = vmul.f32 %v2328_v50, %v1369_v6  ;;  %v1338_v12 = vadd.f32 %v2321_v43, %v1270_v7  ;;  %939 = vst.msk [vmem:[#allocation2 + $0x10] sm:$0xff] %vm936_vm3, %v777_v1 }
  0xab   : > { %vm1449_vm8 = vcmp.ge.f32.partialorder %v1385_v9, 0.0  ;;  %v1517_v13 = vmul.f32 %v2328_v50, %v1385_v9  ;;  %v1354_v14 = vadd.f32 %v2321_v43, %v1286_v10  ;;  %955 = vst.msk [vmem:[#allocation2 + $0x90] sm:$0xff] %vm936_vm3, %v817_v2 }
  0xac   : > { %v1565_v15 = vsel %vm1433_vm7, %v1369_v6, %v1501_v11  ;;  %vm1402_vm9 = vcmp.ge.f32.partialorder %v1338_v12, 0.0  ;;  %v1470_v16 = vmul.f32 %v2328_v50, %v1338_v12 }
  0xad   : > { %v1629_v17 = vpack.c.bf16 %v1565_v15, %v1565_v15  ;;  %v1581_v18 = vsel %vm1449_vm8, %v1385_v9, %v1517_v13  ;;  %vm1418_vm10 = vcmp.ge.f32.partialorder %v1354_v14, 0.0  ;;  %v1486_v19 = vmul.f32 %v2328_v50, %v1354_v14  ;;  %v1234_v20 = vld [vmem:[#allocation2 + $0x108] sm:$0xff]  ;;  %v857_v21 = vpop.f32.mrf.mxu2  ;;  %v897_v22 = vpop.f32.mrf.mxu3 }
  0xae   : > { %v1645_v23 = vpack.c.bf16 %v1581_v18, %v1581_v18  ;;  %v1534_v24 = vsel %vm1402_vm9, %v1338_v12, %v1470_v16  ;;  %v1302_v25 = vmul.f32 %v2316_v42, %v1234_v20  ;;  %v1250_v26 = vld [vmem:[#allocation2 + $0x188] sm:$0xff]  ;;  %971 = vst.msk [vmem:[#allocation2 + $0x110] sm:$0xff] %vm936_vm3, %v857_v21  ;;  %v779_v27 = vpop.f32.mrf.mxu0  ;;  %v819_v28 = vpop.f32.mrf.mxu1 }
  0xaf   : > { %1694 = vst.msk [vmem:[%s2343_s16 + $0x80] sm:$0xf] %vm1661_vm6, %v1629_v17  ;;  %v1598_v29 = vpack.c.bf16 %v1534_v24, %v1534_v24  ;;  %v1550_v30 = vsel %vm1418_vm10, %v1354_v14, %v1486_v19  ;;  %v1318_v31 = vmul.f32 %v2316_v42, %v1250_v26 }
  0xb0   : > { %1710 = vst.msk [vmem:[%s2343_s16 + $0xc0] sm:$0xf] %vm1661_vm6, %v1645_v23  ;;  %v1614_v32 = vpack.c.bf16 %v1550_v30, %v1550_v30  ;;  %v1370_v33 = vadd.f32 %v2321_v43, %v1302_v25 }
  0xb1   : > { %1663 = vst.msk [vmem:[%s2343_s16 + $0x4] sm:$0xf] %vm1661_vm6, %v1598_v29  ;;  %v1386_v34 = vadd.f32 %v2321_v43, %v1318_v31  ;;  %v1203_v35 = vld [vmem:[#allocation2 + $0x10] sm:$0xff] }
  0xb2   : > { %1679 = vst.msk [vmem:[%s2343_s16 + $0x44] sm:$0xf] %vm1661_vm6, %v1614_v32  ;;  %vm1434_vm11 = vcmp.ge.f32.partialorder %v1370_v33, 0.0  ;;  %v1502_v36 = vmul.f32 %v2328_v50, %v1370_v33  ;;  %v1271_v37 = vmul.f32 %v2316_v42, %v1203_v35  ;;  %v1219_v38 = vld [vmem:[#allocation2 + $0x90] sm:$0xff] }
  0xb3   : > { %vm1450_vm12 = vcmp.ge.f32.partialorder %v1386_v34, 0.0  ;;  %v1518_v39 = vmul.f32 %v2328_v50, %v1386_v34  ;;  %v1287_v40 = vmul.f32 %v2316_v42, %v1219_v38  ;;  %987 = vst.msk [vmem:[#allocation2 + $0x190] sm:$0xff] %vm936_vm3, %v897_v22 }
  0xb4   : > { %v1566_v41 = vsel %vm1434_vm11, %v1370_v33, %v1502_v36  ;;  %v1339_v44 = vadd.f32 %v2321_v43, %v1271_v37  ;;  %940 = vst.msk [vmem:[#allocation2 + $0x18] sm:$0xff] %vm936_vm3, %v779_v27 }
  0xb5   : > { %v1630_v45 = vpack.c.bf16 %v1566_v41, %v1566_v41  ;;  %v1582_v46 = vsel %vm1450_vm12, %v1386_v34, %v1518_v39  ;;  %v1355_v47 = vadd.f32 %v2321_v43, %v1287_v40  ;;  %v1235_v48 = vld [vmem:[#allocation2 + $0x110] sm:$0xff]  ;;  %956 = vst.msk [vmem:[#allocation2 + $0x98] sm:$0xff] %vm936_vm3, %v819_v28  ;;  %v859_v49 = vpop.f32.mrf.mxu2  ;;  %v899_v51 = vpop.f32.mrf.mxu3 }
  0xb6   : > { %v1646_v52 = vpack.c.bf16 %v1582_v46, %v1582_v46  ;;  %vm1403_vm13 = vcmp.ge.f32.partialorder %v1339_v44, 0.0  ;;  %v1471_v53 = vmul.f32 %v2328_v50, %v1339_v44  ;;  %v1303_v54 = vmul.f32 %v2316_v42, %v1235_v48  ;;  %972 = vst.msk [vmem:[#allocation2 + $0x118] sm:$0xff] %vm936_vm3, %v859_v49  ;;  %v782_v55 = vpop.f32.mrf.mxu0  ;;  %v822_v56 = vpop.f32.mrf.mxu1 }
  0xb7   : > { %1695 = vst.msk [vmem:[%s2343_s16 + $0x84] sm:$0xf] %vm1661_vm6, %v1630_v45  ;;  %vm1419_vm14 = vcmp.ge.f32.partialorder %v1355_v47, 0.0  ;;  %v1487_v57 = vmul.f32 %v2328_v50, %v1355_v47 }
  0xb8   : > { %1711 = vst.msk [vmem:[%s2343_s16 + $0xc4] sm:$0xf] %vm1661_vm6, %v1646_v52  ;;  %v1535_v58 = vsel %vm1403_vm13, %v1339_v44, %v1471_v53  ;;  %v1371_v59 = vadd.f32 %v2321_v43, %v1303_v54 }
  0xb9   : > { %v1599_v60 = vpack.c.bf16 %v1535_v58, %v1535_v58  ;;  %v1551_v61 = vsel %vm1419_vm14, %v1355_v47, %v1487_v57  ;;  %988 = vst.msk [vmem:[#allocation2 + $0x198] sm:$0xff] %vm936_vm3, %v899_v51 }
  0xba   : > { %v1615_v62 = vpack.c.bf16 %v1551_v61, %v1551_v61  ;;  %vm1435_vm15 = vcmp.ge.f32.partialorder %v1371_v59, 0.0  ;;  %v1503_v63 = vmul.f32 %v2328_v50, %v1371_v59  ;;  %v1251_v0 = vld [vmem:[#allocation2 + $0x190] sm:$0xff]  ;;  %941 = vst.msk [vmem:[#allocation2 + $0x20] sm:$0xff] %vm936_vm3, %v782_v55 }
  0xbb   : > { %1664 = vst.msk [vmem:[%s2343_s16 + $0x8] sm:$0xf] %vm1661_vm6, %v1599_v60  ;;  %v1319_v1 = vmul.f32 %v2316_v42, %v1251_v0  ;;  %v1204_v2 = vld [vmem:[#allocation2 + $0x18] sm:$0xff] }
  0xbc   : > { %1680 = vst.msk [vmem:[%s2343_s16 + $0x48] sm:$0xf] %vm1661_vm6, %v1615_v62  ;;  %v1567_v3 = vsel %vm1435_vm15, %v1371_v59, %v1503_v63  ;;  %v1272_v4 = vmul.f32 %v2316_v42, %v1204_v2  ;;  %v1220_v5 = vld [vmem:[#allocation2 + $0x98] sm:$0xff] }
  0xbd   : > { %v1631_v6 = vpack.c.bf16 %v1567_v3, %v1567_v3  ;;  %v1387_v7 = vadd.f32 %v2321_v43, %v1319_v1  ;;  %v1288_v8 = vmul.f32 %v2316_v42, %v1220_v5  ;;  %v1236_v9 = vld [vmem:[#allocation2 + $0x118] sm:$0xff]  ;;  %957 = vst.msk [vmem:[#allocation2 + $0xa0] sm:$0xff] %vm936_vm3, %v822_v56  ;;  %v862_v10 = vpop.f32.mrf.mxu2  ;;  %v902_v11 = vpop.f32.mrf.mxu3 }
  0xbe   : > { %v1340_v12 = vadd.f32 %v2321_v43, %v1272_v4  ;;  %v1304_v13 = vmul.f32 %v2316_v42, %v1236_v9  ;;  %973 = vst.msk [vmem:[#allocation2 + $0x120] sm:$0xff] %vm936_vm3, %v862_v10  ;;  %v784_v14 = vpop.f32.mrf.mxu0  ;;  %v824_v15 = vpop.f32.mrf.mxu1 }
  0xbf   : > { %1696 = vst.msk [vmem:[%s2343_s16 + $0x88] sm:$0xf] %vm1661_vm6, %v1631_v6  ;;  %vm1451_vm0 = vcmp.ge.f32.partialorder %v1387_v7, 0.0  ;;  %v1519_v16 = vmul.f32 %v2328_v50, %v1387_v7  ;;  %v1356_v17 = vadd.f32 %v2321_v43, %v1288_v8 }
  0xc0   : > { %vm1404_vm1 = vcmp.ge.f32.partialorder %v1340_v12, 0.0  ;;  %v1472_v18 = vmul.f32 %v2328_v50, %v1340_v12  ;;  %v1372_v19 = vadd.f32 %v2321_v43, %v1304_v13  ;;  %v1252_v20 = vld [vmem:[#allocation2 + $0x198] sm:$0xff]  ;;  %989 = vst.msk [vmem:[#allocation2 + $0x1a0] sm:$0xff] %vm936_vm3, %v902_v11 }
  0xc1   : > { %v1583_v21 = vsel %vm1451_vm0, %v1387_v7, %v1519_v16  ;;  %vm1420_vm2 = vcmp.ge.f32.partialorder %v1356_v17, 0.0  ;;  %v1488_v22 = vmul.f32 %v2328_v50, %v1356_v17  ;;  %v1320_v23 = vmul.f32 %v2316_v42, %v1252_v20  ;;  %v1205_v24 = vld [vmem:[#allocation2 + $0x20] sm:$0xff]  ;;  %942 = vst.msk [vmem:[#allocation2 + $0x28] sm:$0xff] %vm936_vm3, %v784_v14 }
  0xc2   : > { %v1647_v25 = vpack.c.bf16 %v1583_v21, %v1583_v21  ;;  %v1536_v26 = vsel %vm1404_vm1, %v1340_v12, %v1472_v18  ;;  %vm1436_vm4 = vcmp.ge.f32.partialorder %v1372_v19, 0.0  ;;  %v1504_v27 = vmul.f32 %v2328_v50, %v1372_v19  ;;  %958 = vst.msk [vmem:[#allocation2 + $0xa8] sm:$0xff] %vm936_vm3, %v824_v15 }
  0xc3   : > { %v1600_v28 = vpack.c.bf16 %v1536_v26, %v1536_v26  ;;  %v1552_v29 = vsel %vm1420_vm2, %v1356_v17, %v1488_v22  ;;  %v1388_v30 = vadd.f32 %v2321_v43, %v1320_v23  ;;  %v1273_v31 = vmul.f32 %v2316_v42, %v1205_v24 }
  0xc4   : > { %1712 = vst.msk [vmem:[%s2343_s16 + $0xc8] sm:$0xf] %vm1661_vm6, %v1647_v25  ;;  %v1616_v32 = vpack.c.bf16 %v1552_v29, %v1552_v29  ;;  %v1568_v33 = vsel %vm1436_vm4, %v1372_v19, %v1504_v27  ;;  %v1221_v34 = vld [vmem:[#allocation2 + $0xa0] sm:$0xff] }
  0xc5   : > { %1665 = vst.msk [vmem:[%s2343_s16 + $0xc] sm:$0xf] %vm1661_vm6, %v1600_v28  ;;  %v1632_v35 = vpack.c.bf16 %v1568_v33, %v1568_v33  ;;  %vm1452_vm5 = vcmp.ge.f32.partialorder %v1388_v30, 0.0  ;;  %v1520_v36 = vmul.f32 %v2328_v50, %v1388_v30  ;;  %v1341_v37 = vadd.f32 %v2321_v43, %v1273_v31  ;;  %v1237_v38 = vld [vmem:[#allocation2 + $0x120] sm:$0xff]  ;;  %v864_v39 = vpop.f32.mrf.mxu2  ;;  %v904_v40 = vpop.f32.mrf.mxu3 }
  0xc6   : > { %1681 = vst.msk [vmem:[%s2343_s16 + $0x4c] sm:$0xf] %vm1661_vm6, %v1616_v32  ;;  %v1289_v41 = vmul.f32 %v2316_v42, %v1221_v34  ;;  %v1305_v44 = vmul.f32 %v2316_v42, %v1237_v38  ;;  %v787_v45 = vpop.f32.mrf.mxu0  ;;  %v827_v46 = vpop.f32.mrf.mxu1 }
  0xc7   : > { %1697 = vst.msk [vmem:[%s2343_s16 + $0x8c] sm:$0xf] %vm1661_vm6, %v1632_v35  ;;  %v1584_v47 = vsel %vm1452_vm5, %v1388_v30, %v1520_v36  ;;  %vm1405_vm7 = vcmp.ge.f32.partialorder %v1341_v37, 0.0  ;;  %v1473_v48 = vmul.f32 %v2328_v50, %v1341_v37  ;;  %v1253_v49 = vld [vmem:[#allocation2 + $0x1a0] sm:$0xff] }
  0xc8   : > { %v1648_v51 = vpack.c.bf16 %v1584_v47, %v1584_v47  ;;  %v1357_v52 = vadd.f32 %v2321_v43, %v1289_v41  ;;  %v1373_v53 = vadd.f32 %v2321_v43, %v1305_v44  ;;  %v1321_v54 = vmul.f32 %v2316_v42, %v1253_v49  ;;  %v1206_v55 = vld [vmem:[#allocation2 + $0x28] sm:$0xff]  ;;  %974 = vst.msk [vmem:[#allocation2 + $0x128] sm:$0xff] %vm936_vm3, %v864_v39 }
  0xc9   : > { %v1537_v56 = vsel %vm1405_vm7, %v1341_v37, %v1473_v48  ;;  %v1274_v57 = vmul.f32 %v2316_v42, %v1206_v55  ;;  %v1222_v58 = vld [vmem:[#allocation2 + $0xa8] sm:$0xff]  ;;  %990 = vst.msk [vmem:[#allocation2 + $0x1a8] sm:$0xff] %vm936_vm3, %v904_v40 }
  0xca   : > { %1713 = vst.msk [vmem:[%s2343_s16 + $0xcc] sm:$0xf] %vm1661_vm6, %v1648_v51  ;;  %v1601_v59 = vpack.c.bf16 %v1537_v56, %v1537_v56  ;;  %vm1421_vm8 = vcmp.ge.f32.partialorder %v1357_v52, 0.0  ;;  %v1489_v60 = vmul.f32 %v2328_v50, %v1357_v52  ;;  %vm1437_vm9 = vcmp.ge.f32.partialorder %v1373_v53, 0.0 }
  0xcb   : > { %v1505_v61 = vmul.f32 %v2328_v50, %v1373_v53  ;;  %v1389_v62 = vadd.f32 %v2321_v43, %v1321_v54  ;;  %v1342_v63 = vadd.f32 %v2321_v43, %v1274_v57  ;;  %v1290_v0 = vmul.f32 %v2316_v42, %v1222_v58  ;;  %943 = vst.msk [vmem:[#allocation2 + $0x30] sm:$0xff] %vm936_vm3, %v787_v45 }
  0xcc   : > { %1666 = vst.msk [vmem:[%s2343_s16 + $0x10] sm:$0xf] %vm1661_vm6, %v1601_v59  ;;  %v1553_v1 = vsel %vm1421_vm8, %v1357_v52, %v1489_v60 }
  0xcd   : > { %v1617_v2 = vpack.c.bf16 %v1553_v1, %v1553_v1  ;;  %v1569_v3 = vsel %vm1437_vm9, %v1373_v53, %v1505_v61  ;;  %vm1453_vm10 = vcmp.ge.f32.partialorder %v1389_v62, 0.0  ;;  %v1521_v4 = vmul.f32 %v2328_v50, %v1389_v62  ;;  %959 = vst.msk [vmem:[#allocation2 + $0xb0] sm:$0xff] %vm936_vm3, %v827_v46  ;;  %v867_v5 = vpop.f32.mrf.mxu2  ;;  %v907_v6 = vpop.f32.mrf.mxu3 }
  0xce   : > { %v1633_v7 = vpack.c.bf16 %v1569_v3, %v1569_v3  ;;  %vm1406_vm11 = vcmp.ge.f32.partialorder %v1342_v63, 0.0  ;;  %v1474_v8 = vmul.f32 %v2328_v50, %v1342_v63  ;;  %v1358_v9 = vadd.f32 %v2321_v43, %v1290_v0  ;;  %975 = vst.msk [vmem:[#allocation2 + $0x130] sm:$0xff] %vm936_vm3, %v867_v5  ;;  %v789_v10 = vpop.f32.mrf.mxu0  ;;  %v829_v11 = vpop.f32.mrf.mxu1 }
  0xcf   : > { %1682 = vst.msk [vmem:[%s2343_s16 + $0x50] sm:$0xf] %vm1661_vm6, %v1617_v2  ;;  %v1585_v12 = vsel %vm1453_vm10, %v1389_v62, %v1521_v4  ;;  %v1238_v13 = vld [vmem:[#allocation2 + $0x128] sm:$0xff] }
  0xd0   : > { %1698 = vst.msk [vmem:[%s2343_s16 + $0x90] sm:$0xf] %vm1661_vm6, %v1633_v7  ;;  %v1649_v14 = vpack.c.bf16 %v1585_v12, %v1585_v12  ;;  %v1538_v15 = vsel %vm1406_vm11, %v1342_v63, %v1474_v8  ;;  %vm1422_vm12 = vcmp.ge.f32.partialorder %v1358_v9, 0.0  ;;  %v1490_v16 = vmul.f32 %v2328_v50, %v1358_v9  ;;  %v1254_v17 = vld [vmem:[#allocation2 + $0x1a8] sm:$0xff] }
  0xd1   : > { %v1602_v18 = vpack.c.bf16 %v1538_v15, %v1538_v15  ;;  %v1306_v19 = vmul.f32 %v2316_v42, %v1238_v13  ;;  %v1322_v20 = vmul.f32 %v2316_v42, %v1254_v17  ;;  %991 = vst.msk [vmem:[#allocation2 + $0x1b0] sm:$0xff] %vm936_vm3, %v907_v6 }
  0xd2   : > { %1714 = vst.msk [vmem:[%s2343_s16 + $0xd0] sm:$0xf] %vm1661_vm6, %v1649_v14  ;;  %v1554_v21 = vsel %vm1422_vm12, %v1358_v9, %v1490_v16  ;;  %v1207_v22 = vld [vmem:[#allocation2 + $0x30] sm:$0xff] }
  0xd3   : > { %1667 = vst.msk [vmem:[%s2343_s16 + $0x14] sm:$0xf] %vm1661_vm6, %v1602_v18  ;;  %v1618_v23 = vpack.c.bf16 %v1554_v21, %v1554_v21  ;;  %v1374_v24 = vadd.f32 %v2321_v43, %v1306_v19  ;;  %v1390_v25 = vadd.f32 %v2321_v43, %v1322_v20  ;;  %v1275_v26 = vmul.f32 %v2316_v42, %v1207_v22 }
  0xd4   : > { %v1223_v27 = vld [vmem:[#allocation2 + $0xb0] sm:$0xff]  ;;  %944 = vst.msk [vmem:[#allocation2 + $0x38] sm:$0xff] %vm936_vm3, %v789_v10 }
  0xd5   : > { %1683 = vst.msk [vmem:[%s2343_s16 + $0x54] sm:$0xf] %vm1661_vm6, %v1618_v23  ;;  %vm1438_vm13 = vcmp.ge.f32.partialorder %v1374_v24, 0.0  ;;  %v1506_v28 = vmul.f32 %v2328_v50, %v1374_v24  ;;  %vm1454_vm14 = vcmp.ge.f32.partialorder %v1390_v25, 0.0  ;;  %v1522_v29 = vmul.f32 %v2328_v50, %v1390_v25  ;;  %v1239_v30 = vld [vmem:[#allocation2 + $0x130] sm:$0xff]  ;;  %v869_v31 = vpop.f32.mrf.mxu2  ;;  %v909_v32 = vpop.f32.mrf.mxu3 }
  0xd6   : > { %v1343_v33 = vadd.f32 %v2321_v43, %v1275_v26  ;;  %v1291_v34 = vmul.f32 %v2316_v42, %v1223_v27  ;;  %v1307_v35 = vmul.f32 %v2316_v42, %v1239_v30  ;;  %960 = vst.msk [vmem:[#allocation2 + $0xb8] sm:$0xff] %vm936_vm3, %v829_v11  ;;  %v792_v36 = vpop.f32.mrf.mxu0  ;;  %v832_v37 = vpop.f32.mrf.mxu1 }
  0xd7   : > { %v1570_v38 = vsel %vm1438_vm13, %v1374_v24, %v1506_v28  ;;  %v1586_v39 = vsel %vm1454_vm14, %v1390_v25, %v1522_v29  ;;  %976 = vst.msk [vmem:[#allocation2 + $0x138] sm:$0xff] %vm936_vm3, %v869_v31 }
  0xd8   : > { %v1634_v40 = vpack.c.bf16 %v1570_v38, %v1570_v38  ;;  %v1650_v41 = vpack.c.bf16 %v1586_v39, %v1586_v39  ;;  %vm1407_vm15 = vcmp.ge.f32.partialorder %v1343_v33, 0.0  ;;  %v1475_v44 = vmul.f32 %v2328_v50, %v1343_v33  ;;  %v1255_v45 = vld [vmem:[#allocation2 + $0x1b0] sm:$0xff]  ;;  %992 = vst.msk [vmem:[#allocation2 + $0x1b8] sm:$0xff] %vm936_vm3, %v909_v32 }
  0xd9   : > { %v1359_v46 = vadd.f32 %v2321_v43, %v1291_v34  ;;  %v1375_v47 = vadd.f32 %v2321_v43, %v1307_v35  ;;  %v1323_v48 = vmul.f32 %v2316_v42, %v1255_v45  ;;  %945 = vst.msk [vmem:[#allocation2 + $0x40] sm:$0xff] %vm936_vm3, %v792_v36 }
  0xda   : > { %1699 = vst.msk [vmem:[%s2343_s16 + $0x94] sm:$0xf] %vm1661_vm6, %v1634_v40  ;;  %v1539_v49 = vsel %vm1407_vm15, %v1343_v33, %v1475_v44 }
  0xdb   : > { %1715 = vst.msk [vmem:[%s2343_s16 + $0xd4] sm:$0xf] %vm1661_vm6, %v1650_v41  ;;  %v1603_v51 = vpack.c.bf16 %v1539_v49, %v1539_v49  ;;  %vm1423_vm0 = vcmp.ge.f32.partialorder %v1359_v46, 0.0  ;;  %v1491_v52 = vmul.f32 %v2328_v50, %v1359_v46  ;;  %vm1439_vm1 = vcmp.ge.f32.partialorder %v1375_v47, 0.0  ;;  %v1208_v53 = vld [vmem:[#allocation2 + $0x38] sm:$0xff] }
  0xdc   : > { %v1507_v54 = vmul.f32 %v2328_v50, %v1375_v47  ;;  %v1391_v55 = vadd.f32 %v2321_v43, %v1323_v48  ;;  %v1276_v56 = vmul.f32 %v2316_v42, %v1208_v53  ;;  %961 = vst.msk [vmem:[#allocation2 + $0xc0] sm:$0xff] %vm936_vm3, %v832_v37 }
  0xdd   : > { %1668 = vst.msk [vmem:[%s2343_s16 + $0x18] sm:$0xf] %vm1661_vm6, %v1603_v51  ;;  %v1555_v57 = vsel %vm1423_vm0, %v1359_v46, %v1491_v52  ;;  %v1224_v58 = vld [vmem:[#allocation2 + $0xb8] sm:$0xff]  ;;  %v872_v59 = vpop.f32.mrf.mxu2  ;;  %v912_v60 = vpop.f32.mrf.mxu3 }
  0xde   : > { %v1619_v61 = vpack.c.bf16 %v1555_v57, %v1555_v57  ;;  %v1571_v62 = vsel %vm1439_vm1, %v1375_v47, %v1507_v54  ;;  %vm1455_vm2 = vcmp.ge.f32.partialorder %v1391_v55, 0.0  ;;  %v1523_v63 = vmul.f32 %v2328_v50, %v1391_v55  ;;  %v1240_v0 = vld [vmem:[#allocation2 + $0x138] sm:$0xff]  ;;  %977 = vst.msk [vmem:[#allocation2 + $0x140] sm:$0xff] %vm936_vm3, %v872_v59  ;;  %v794_v1 = vpop.f32.mrf.mxu0  ;;  %v834_v2 = vpop.f32.mrf.mxu1 }
  0xdf   : > { %v1635_v3 = vpack.c.bf16 %v1571_v62, %v1571_v62  ;;  %v1344_v4 = vadd.f32 %v2321_v43, %v1276_v56  ;;  %v1292_v5 = vmul.f32 %v2316_v42, %v1224_v58  ;;  %v1308_v6 = vmul.f32 %v2316_v42, %v1240_v0  ;;  %v1256_v7 = vld [vmem:[#allocation2 + $0x1b8] sm:$0xff]  ;;  %993 = vst.msk [vmem:[#allocation2 + $0x1c0] sm:$0xff] %vm936_vm3, %v912_v60 }
  0xe0   : > { %1684 = vst.msk [vmem:[%s2343_s16 + $0x58] sm:$0xf] %vm1661_vm6, %v1619_v61  ;;  %v1587_v8 = vsel %vm1455_vm2, %v1391_v55, %v1523_v63  ;;  %v1324_v9 = vmul.f32 %v2316_v42, %v1256_v7  ;;  %v1209_v10 = vld [vmem:[#allocation2 + $0x40] sm:$0xff] }
  0xe1   : > { %1700 = vst.msk [vmem:[%s2343_s16 + $0x98] sm:$0xf] %vm1661_vm6, %v1635_v3  ;;  %v1651_v11 = vpack.c.bf16 %v1587_v8, %v1587_v8  ;;  %vm1408_vm4 = vcmp.ge.f32.partialorder %v1344_v4, 0.0  ;;  %v1476_v12 = vmul.f32 %v2328_v50, %v1344_v4  ;;  %v1360_v13 = vadd.f32 %v2321_v43, %v1292_v5 }
  0xe2   : > { %v1376_v14 = vadd.f32 %v2321_v43, %v1308_v6  ;;  %v1392_v15 = vadd.f32 %v2321_v43, %v1324_v9  ;;  %v1277_v16 = vmul.f32 %v2316_v42, %v1209_v10  ;;  %946 = vst.msk [vmem:[#allocation2 + $0x48] sm:$0xff] %vm936_vm3, %v794_v1 }
  0xe3   : > { %1716 = vst.msk [vmem:[%s2343_s16 + $0xd8] sm:$0xf] %vm1661_vm6, %v1651_v11  ;;  %v1540_v17 = vsel %vm1408_vm4, %v1344_v4, %v1476_v12  ;;  %vm1424_vm5 = vcmp.ge.f32.partialorder %v1360_v13, 0.0  ;;  %v1492_v18 = vmul.f32 %v2328_v50, %v1360_v13  ;;  %v1225_v19 = vld [vmem:[#allocation2 + $0xc0] sm:$0xff] }
  0xe4   : > { %v1604_v20 = vpack.c.bf16 %v1540_v17, %v1540_v17  ;;  %vm1440_vm7 = vcmp.ge.f32.partialorder %v1376_v14, 0.0  ;;  %v1508_v21 = vmul.f32 %v2328_v50, %v1376_v14  ;;  %vm1456_vm8 = vcmp.ge.f32.partialorder %v1392_v15, 0.0  ;;  %962 = vst.msk [vmem:[#allocation2 + $0xc8] sm:$0xff] %vm936_vm3, %v834_v2 }
  0xe5   : > { %v1556_v22 = vsel %vm1424_vm5, %v1360_v13, %v1492_v18  ;;  %v1524_v23 = vmul.f32 %v2328_v50, %v1392_v15  ;;  %v1345_v24 = vadd.f32 %v2321_v43, %v1277_v16  ;;  %v1293_v25 = vmul.f32 %v2316_v42, %v1225_v19  ;;  %v1241_v26 = vld [vmem:[#allocation2 + $0x140] sm:$0xff]  ;;  %v874_v27 = vpop.f32.mrf.mxu2  ;;  %v914_v28 = vpop.f32.mrf.mxu3 }
  0xe6   : > { %1669 = vst.msk [vmem:[%s2343_s16 + $0x1c] sm:$0xf] %vm1661_vm6, %v1604_v20  ;;  %v1620_v29 = vpack.c.bf16 %v1556_v22, %v1556_v22  ;;  %v1572_v30 = vsel %vm1440_vm7, %v1376_v14, %v1508_v21  ;;  %v1309_v31 = vmul.f32 %v2316_v42, %v1241_v26  ;;  %v1257_v32 = vld [vmem:[#allocation2 + $0x1c0] sm:$0xff]  ;;  %v797_v33 = vpop.f32.mrf.mxu0  ;;  %v837_v34 = vpop.f32.mrf.mxu1 }
  0xe7   : > { %v1636_v35 = vpack.c.bf16 %v1572_v30, %v1572_v30  ;;  %v1588_v36 = vsel %vm1456_vm8, %v1392_v15, %v1524_v23  ;;  %vm1409_vm9 = vcmp.ge.f32.partialorder %v1345_v24, 0.0  ;;  %v1477_v37 = vmul.f32 %v2328_v50, %v1345_v24  ;;  %978 = vst.msk [vmem:[#allocation2 + $0x148] sm:$0xff] %vm936_vm3, %v874_v27 }
  0xe8   : > { %1685 = vst.msk [vmem:[%s2343_s16 + $0x5c] sm:$0xf] %vm1661_vm6, %v1620_v29  ;;  %v1652_v38 = vpack.c.bf16 %v1588_v36, %v1588_v36  ;;  %v1361_v39 = vadd.f32 %v2321_v43, %v1293_v25  ;;  %v1377_v40 = vadd.f32 %v2321_v43, %v1309_v31  ;;  %v1325_v41 = vmul.f32 %v2316_v42, %v1257_v32 }
  0xe9   : > { %1701 = vst.msk [vmem:[%s2343_s16 + $0x9c] sm:$0xf] %vm1661_vm6, %v1636_v35  ;;  %v1541_v44 = vsel %vm1409_vm9, %v1345_v24, %v1477_v37  ;;  %v1210_v45 = vld [vmem:[#allocation2 + $0x48] sm:$0xff] }
  0xea   : > { %1717 = vst.msk [vmem:[%s2343_s16 + $0xdc] sm:$0xf] %vm1661_vm6, %v1652_v38  ;;  %v1605_v46 = vpack.c.bf16 %v1541_v44, %v1541_v44  ;;  %vm1425_vm10 = vcmp.ge.f32.partialorder %v1361_v39, 0.0  ;;  %v1493_v47 = vmul.f32 %v2328_v50, %v1361_v39  ;;  %vm1441_vm11 = vcmp.ge.f32.partialorder %v1377_v40, 0.0 }
  0xeb   : > { %v1509_v48 = vmul.f32 %v2328_v50, %v1377_v40  ;;  %v1393_v49 = vadd.f32 %v2321_v43, %v1325_v41  ;;  %v1278_v51 = vmul.f32 %v2316_v42, %v1210_v45  ;;  %v1226_v52 = vld [vmem:[#allocation2 + $0xc8] sm:$0xff]  ;;  %994 = vst.msk [vmem:[#allocation2 + $0x1c8] sm:$0xff] %vm936_vm3, %v914_v28 }
  0xec   : > { %1670 = vst.msk [vmem:[%s2343_s16 + $0x20] sm:$0xf] %vm1661_vm6, %v1605_v46  ;;  %v1557_v53 = vsel %vm1425_vm10, %v1361_v39, %v1493_v47  ;;  %v1294_v54 = vmul.f32 %v2316_v42, %v1226_v52 }
  0xed   : > { %v1621_v55 = vpack.c.bf16 %v1557_v53, %v1557_v53  ;;  %v1573_v56 = vsel %vm1441_vm11, %v1377_v40, %v1509_v48  ;;  %vm1457_vm12 = vcmp.ge.f32.partialorder %v1393_v49, 0.0  ;;  %v1525_v57 = vmul.f32 %v2328_v50, %v1393_v49  ;;  %947 = vst.msk [vmem:[#allocation2 + $0x50] sm:$0xff] %vm936_vm3, %v797_v33  ;;  %v877_v58 = vpop.f32.mrf.mxu2  ;;  %v917_v59 = vpop.f32.mrf.mxu3 }
  0xee   : > { %v1637_v60 = vpack.c.bf16 %v1573_v56, %v1573_v56  ;;  %v1346_v61 = vadd.f32 %v2321_v43, %v1278_v51  ;;  %v1362_v62 = vadd.f32 %v2321_v43, %v1294_v54  ;;  %v1242_v63 = vld [vmem:[#allocation2 + $0x148] sm:$0xff]  ;;  %963 = vst.msk [vmem:[#allocation2 + $0xd0] sm:$0xff] %vm936_vm3, %v837_v34  ;;  %v799_v0 = vpop.f32.mrf.mxu0  ;;  %v839_v1 = vpop.f32.mrf.mxu1 }
  0xef   : > { %1686 = vst.msk [vmem:[%s2343_s16 + $0x60] sm:$0xf] %vm1661_vm6, %v1621_v55  ;;  %v1589_v2 = vsel %vm1457_vm12, %v1393_v49, %v1525_v57  ;;  %v1310_v3 = vmul.f32 %v2316_v42, %v1242_v63 }
  0xf0   : > { %1702 = vst.msk [vmem:[%s2343_s16 + $0xa0] sm:$0xf] %vm1661_vm6, %v1637_v60  ;;  %v1653_v4 = vpack.c.bf16 %v1589_v2, %v1589_v2  ;;  %vm1410_vm13 = vcmp.ge.f32.partialorder %v1346_v61, 0.0  ;;  %v1478_v5 = vmul.f32 %v2328_v50, %v1346_v61  ;;  %vm1426_vm14 = vcmp.ge.f32.partialorder %v1362_v62, 0.0 }
  0xf1   : > { %v1494_v6 = vmul.f32 %v2328_v50, %v1362_v62  ;;  %v1378_v7 = vadd.f32 %v2321_v43, %v1310_v3  ;;  %979 = vst.msk [vmem:[#allocation2 + $0x150] sm:$0xff] %vm936_vm3, %v877_v58 }
  0xf2   : > { %1718 = vst.msk [vmem:[%s2343_s16 + $0xe0] sm:$0xf] %vm1661_vm6, %v1653_v4  ;;  %v1542_v8 = vsel %vm1410_vm13, %v1346_v61, %v1478_v5  ;;  %v1258_v9 = vld [vmem:[#allocation2 + $0x1c8] sm:$0xff] }
  0xf3   : > { %v1606_v10 = vpack.c.bf16 %v1542_v8, %v1542_v8  ;;  %v1558_v11 = vsel %vm1426_vm14, %v1362_v62, %v1494_v6  ;;  %vm1442_vm15 = vcmp.ge.f32.partialorder %v1378_v7, 0.0  ;;  %v1510_v12 = vmul.f32 %v2328_v50, %v1378_v7  ;;  %995 = vst.msk [vmem:[#allocation2 + $0x1d0] sm:$0xff] %vm936_vm3, %v917_v59 }
  0xf4   : > { %v1622_v13 = vpack.c.bf16 %v1558_v11, %v1558_v11  ;;  %v1326_v14 = vmul.f32 %v2316_v42, %v1258_v9  ;;  %v1211_v15 = vld [vmem:[#allocation2 + $0x50] sm:$0xff]  ;;  %948 = vst.msk [vmem:[#allocation2 + $0x58] sm:$0xff] %vm936_vm3, %v799_v0 }
  0xf5   : > { %1671 = vst.msk [vmem:[%s2343_s16 + $0x24] sm:$0xf] %vm1661_vm6, %v1606_v10  ;;  %v1574_v16 = vsel %vm1442_vm15, %v1378_v7, %v1510_v12  ;;  %v1279_v17 = vmul.f32 %v2316_v42, %v1211_v15  ;;  %v1227_v18 = vld [vmem:[#allocation2 + $0xd0] sm:$0xff]  ;;  %v879_v19 = vpop.f32.mrf.mxu2  ;;  %v919_v20 = vpop.f32.mrf.mxu3 }
  0xf6   : > { %1687 = vst.msk [vmem:[%s2343_s16 + $0x64] sm:$0xf] %vm1661_vm6, %v1622_v13  ;;  %v1638_v21 = vpack.c.bf16 %v1574_v16, %v1574_v16  ;;  %v1394_v22 = vadd.f32 %v2321_v43, %v1326_v14  ;;  %v1295_v23 = vmul.f32 %v2316_v42, %v1227_v18  ;;  %v802_v24 = vpop.f32.mrf.mxu0  ;;  %v842_v25 = vpop.f32.mrf.mxu1 }
  0xf7   : > { %v1347_v26 = vadd.f32 %v2321_v43, %v1279_v17  ;;  %964 = vst.msk [vmem:[#allocation2 + $0xd8] sm:$0xff] %vm936_vm3, %v839_v1 }
  0xf8   : > { %1703 = vst.msk [vmem:[%s2343_s16 + $0xa4] sm:$0xf] %vm1661_vm6, %v1638_v21  ;;  %vm1458_vm0 = vcmp.ge.f32.partialorder %v1394_v22, 0.0  ;;  %v1526_v27 = vmul.f32 %v2328_v50, %v1394_v22  ;;  %v1363_v28 = vadd.f32 %v2321_v43, %v1295_v23  ;;  %v1243_v29 = vld [vmem:[#allocation2 + $0x150] sm:$0xff] }
  0xf9   : > { %vm1411_vm1 = vcmp.ge.f32.partialorder %v1347_v26, 0.0  ;;  %v1479_v30 = vmul.f32 %v2328_v50, %v1347_v26  ;;  %v1311_v31 = vmul.f32 %v2316_v42, %v1243_v29  ;;  %980 = vst.msk [vmem:[#allocation2 + $0x158] sm:$0xff] %vm936_vm3, %v879_v19 }
  0xfa   : > { %v1590_v32 = vsel %vm1458_vm0, %v1394_v22, %v1526_v27  ;;  %vm1427_vm2 = vcmp.ge.f32.partialorder %v1363_v28, 0.0  ;;  %v1495_v33 = vmul.f32 %v2328_v50, %v1363_v28  ;;  %v1259_v34 = vld [vmem:[#allocation2 + $0x1d0] sm:$0xff]  ;;  %996 = vst.msk [vmem:[#allocation2 + $0x1d8] sm:$0xff] %vm936_vm3, %v919_v20 }
  0xfb   : > { %v1654_v35 = vpack.c.bf16 %v1590_v32, %v1590_v32  ;;  %v1543_v36 = vsel %vm1411_vm1, %v1347_v26, %v1479_v30  ;;  %v1379_v37 = vadd.f32 %v2321_v43, %v1311_v31  ;;  %v1327_v38 = vmul.f32 %v2316_v42, %v1259_v34  ;;  %v1212_v39 = vld [vmem:[#allocation2 + $0x58] sm:$0xff]  ;;  %949 = vst.msk [vmem:[#allocation2 + $0x60] sm:$0xff] %vm936_vm3, %v802_v24  ;;  %v2638_v31 = vld [vmem:[%s2744_s2] ss:$0 sm:$0xff] }
  0xfc   : > { %v1607_v40 = vpack.c.bf16 %v1543_v36, %v1543_v36  ;;  %v1559_v41 = vsel %vm1427_vm2, %v1363_v28, %v1495_v33  ;;  %v1280_v44 = vmul.f32 %v2316_v42, %v1212_v39  ;;  %965 = vst.msk [vmem:[#allocation2 + $0xe0] sm:$0xff] %vm936_vm3, %v842_v25  ;;  %v2646_v34 = vld [vmem:[%s2745_s3] ss:$0 sm:$0xff] }
  0xfd   : > { %1719 = vst.msk [vmem:[%s2343_s16 + $0xe4] sm:$0xf] %vm1661_vm6, %v1654_v35  ;;  %v1623_v45 = vpack.c.bf16 %v1559_v41, %v1559_v41  ;;  %vm1443_vm4 = vcmp.ge.f32.partialorder %v1379_v37, 0.0  ;;  %v1511_v46 = vmul.f32 %v2328_v50, %v1379_v37  ;;  %v1395_v47 = vadd.f32 %v2321_v43, %v1327_v38  ;;  %v882_v48 = vpop.f32.mrf.mxu2  ;;  %v922_v49 = vpop.f32.mrf.mxu3  ;;  %v2657_v39 = vld [vmem:[%s2746_s4] ss:$0 sm:$0xff] }
  0xfe   : > { %1672 = vst.msk [vmem:[%s2343_s16 + $0x28] sm:$0xf] %vm1661_vm6, %v1607_v40  ;;  %v1348_v51 = vadd.f32 %v2321_v43, %v1280_v44  ;;  %v1228_v52 = vld [vmem:[#allocation2 + $0xd8] sm:$0xff]  ;;  %v804_v53 = vpop.f32.mrf.mxu0  ;;  %v844_v57 = vpop.f32.mrf.mxu1 }
  0xff   : > { %1688 = vst.msk [vmem:[%s2343_s16 + $0x68] sm:$0xf] %vm1661_vm6, %v1623_v45  ;;  %v1575_v54 = vsel %vm1443_vm4, %v1379_v37, %v1511_v46  ;;  %vm1459_vm5 = vcmp.ge.f32.partialorder %v1395_v47, 0.0  ;;  %v1527_v55 = vmul.f32 %v2328_v50, %v1395_v47  ;;  %v1296_v56 = vmul.f32 %v2316_v42, %v1228_v52 }
 0x100   : > { %v1639_v58 = vpack.c.bf16 %v1575_v54, %v1575_v54  ;;  %vm1412_vm7 = vcmp.ge.f32.partialorder %v1348_v51, 0.0  ;;  %v1480_v59 = vmul.f32 %v2328_v50, %v1348_v51  ;;  %v1244_v60 = vld [vmem:[#allocation2 + $0x158] sm:$0xff]  ;;  %981 = vst.msk [vmem:[#allocation2 + $0x160] sm:$0xff] %vm936_vm3, %v882_v48 }
 0x101   : > { %v1591_v61 = vsel %vm1459_vm5, %v1395_v47, %v1527_v55  ;;  %v1364_v62 = vadd.f32 %v2321_v43, %v1296_v56  ;;  %v1312_v63 = vmul.f32 %v2316_v42, %v1244_v60  ;;  %v1260_v0 = vld [vmem:[#allocation2 + $0x1d8] sm:$0xff]  ;;  %997 = vst.msk [vmem:[#allocation2 + $0x1e0] sm:$0xff] %vm936_vm3, %v922_v49 }
 0x102   : > { %1704 = vst.msk [vmem:[%s2343_s16 + $0xa8] sm:$0xf] %vm1661_vm6, %v1639_v58  ;;  %v1655_v1 = vpack.c.bf16 %v1591_v61, %v1591_v61  ;;  %v1544_v2 = vsel %vm1412_vm7, %v1348_v51, %v1480_v59  ;;  %v1328_v3 = vmul.f32 %v2316_v42, %v1260_v0  ;;  %v1213_v4 = vld [vmem:[#allocation2 + $0x60] sm:$0xff] }
 0x103   : > { %v1608_v5 = vpack.c.bf16 %v1544_v2, %v1544_v2  ;;  %vm1428_vm8 = vcmp.ge.f32.partialorder %v1364_v62, 0.0  ;;  %v1496_v6 = vmul.f32 %v2328_v50, %v1364_v62  ;;  %v1380_v7 = vadd.f32 %v2321_v43, %v1312_v63  ;;  %v1229_v8 = vld [vmem:[#allocation2 + $0xe0] sm:$0xff]  ;;  %950 = vst.msk [vmem:[#allocation2 + $0x68] sm:$0xff] %vm936_vm3, %v804_v53 }
 0x104   : > { %1720 = vst.msk [vmem:[%s2343_s16 + $0xe8] sm:$0xf] %vm1661_vm6, %v1655_v1  ;;  %v1396_v9 = vadd.f32 %v2321_v43, %v1328_v3  ;;  %v1281_v10 = vmul.f32 %v2316_v42, %v1213_v4  ;;  %v1297_v11 = vmul.f32 %v2316_v42, %v1229_v8 }
 0x105   : > { %1673 = vst.msk [vmem:[%s2343_s16 + $0x2c] sm:$0xf] %vm1661_vm6, %v1608_v5  ;;  %v1560_v12 = vsel %vm1428_vm8, %v1364_v62, %v1496_v6  ;;  %vm1444_vm9 = vcmp.ge.f32.partialorder %v1380_v7, 0.0  ;;  %v1512_v13 = vmul.f32 %v2328_v50, %v1380_v7  ;;  %v884_v14 = vpop.f32.mrf.mxu2  ;;  %v924_v15 = vpop.f32.mrf.mxu3 }
 0x106   : > { %v1624_v16 = vpack.c.bf16 %v1560_v12, %v1560_v12  ;;  %vm1460_vm10 = vcmp.ge.f32.partialorder %v1396_v9, 0.0  ;;  %v1528_v17 = vmul.f32 %v2328_v50, %v1396_v9  ;;  %v1349_v18 = vadd.f32 %v2321_v43, %v1281_v10  ;;  %966 = vst.msk [vmem:[#allocation2 + $0xe8] sm:$0xff] %vm936_vm3, %v844_v57  ;;  %v807_v26 = vpop.f32.mrf.mxu0  ;;  %v847_v29 = vpop.f32.mrf.mxu1 }
 0x107   : > { %v1576_v19 = vsel %vm1444_vm9, %v1380_v7, %v1512_v13  ;;  %v1365_v20 = vadd.f32 %v2321_v43, %v1297_v11  ;;  %v1245_v21 = vld [vmem:[#allocation2 + $0x160] sm:$0xff]  ;;  %982 = vst.msk [vmem:[#allocation2 + $0x168] sm:$0xff] %vm936_vm3, %v884_v14 }
 0x108   : > { %1689 = vst.msk [vmem:[%s2343_s16 + $0x6c] sm:$0xf] %vm1661_vm6, %v1624_v16  ;;  %v1640_v22 = vpack.c.bf16 %v1576_v19, %v1576_v19  ;;  %v1592_v23 = vsel %vm1460_vm10, %v1396_v9, %v1528_v17  ;;  %vm1413_vm11 = vcmp.ge.f32.partialorder %v1349_v18, 0.0  ;;  %v1481_v24 = vmul.f32 %v2328_v50, %v1349_v18  ;;  %v1261_v25 = vld [vmem:[#allocation2 + $0x1e0] sm:$0xff] }
 0x109   : > { %v1656_v27 = vpack.c.bf16 %v1592_v23, %v1592_v23  ;;  %vm1429_vm12 = vcmp.ge.f32.partialorder %v1365_v20, 0.0  ;;  %v1497_v28 = vmul.f32 %v2328_v50, %v1365_v20  ;;  %v1313_v43 = vmul.f32 %v2316_v42, %v1245_v21  ;;  %998 = vst.msk [vmem:[#allocation2 + $0x1e8] sm:$0xff] %vm936_vm3, %v924_v15 }
 0x10a   : > { %1705 = vst.msk [vmem:[%s2343_s16 + $0xac] sm:$0xf] %vm1661_vm6, %v1640_v22  ;;  %v1545_v30 = vsel %vm1413_vm11, %v1349_v18, %v1481_v24  ;;  %v1329_v32 = vmul.f32 %v2638_v31, %v1261_v25  ;;  %v1214_v33 = vld [vmem:[#allocation2 + $0x68] sm:$0xff] }
 0x10b   : > { %1721 = vst.msk [vmem:[%s2343_s16 + $0xec] sm:$0xf] %vm1661_vm6, %v1656_v27  ;;  %v1609_v50 = vpack.c.bf16 %v1545_v30, %v1545_v30  ;;  %v1561_v42 = vsel %vm1429_vm12, %v1365_v20, %v1497_v28  ;;  %v1381_v35 = vadd.f32 %v2646_v34, %v1313_v43  ;;  %v1282_v36 = vmul.f32 %v2638_v31, %v1214_v33 }
 0x10c   : > { %v1625_v37 = vpack.c.bf16 %v1561_v42, %v1561_v42  ;;  %v1397_v38 = vadd.f32 %v2646_v34, %v1329_v32  ;;  %951 = vst.msk [vmem:[#allocation2 + $0x70] sm:$0xff] %vm936_vm3, %v807_v26 }
 0x10d   : > { %1674 = vst.msk [vmem:[%s2343_s16 + $0x30] sm:$0xf] %vm1661_vm6, %v1609_v50  ;;  %vm1445_vm13 = vcmp.ge.f32.partialorder %v1381_v35, 0.0  ;;  %v1513_v40 = vmul.f32 %v2657_v39, %v1381_v35  ;;  %v1350_v41 = vadd.f32 %v2646_v34, %v1282_v36  ;;  %v1230_v44 = vld [vmem:[#allocation2 + $0xe8] sm:$0xff]  ;;  %v887_v45 = vpop.f32.mrf.mxu2  ;;  %v927_v49 = vpop.f32.mrf.mxu3 }
 0x10e   : > { %1690 = vst.msk [vmem:[%s2343_s16 + $0x70] sm:$0xf] %vm1661_vm6, %v1625_v37  ;;  %vm1461_vm14 = vcmp.ge.f32.partialorder %v1397_v38, 0.0  ;;  %v1529_v46 = vmul.f32 %v2657_v39, %v1397_v38  ;;  %v1298_v47 = vmul.f32 %v2638_v31, %v1230_v44  ;;  %v1246_v48 = vld [vmem:[#allocation2 + $0x168] sm:$0xff]  ;;  %v809_v0 = vpop.f32.mrf.mxu0  ;;  %v849_v4 = vpop.f32.mrf.mxu1 }
 0x10f   : > { %v1577_v51 = vsel %vm1445_vm13, %v1381_v35, %v1513_v40  ;;  %vm1414_vm15 = vcmp.ge.f32.partialorder %v1350_v41, 0.0  ;;  %v1482_v52 = vmul.f32 %v2657_v39, %v1350_v41  ;;  %v1314_v53 = vmul.f32 %v2638_v31, %v1246_v48  ;;  %967 = vst.msk [vmem:[#allocation2 + $0xf0] sm:$0xff] %vm936_vm3, %v847_v29 }
 0x110   : > { %v1641_v54 = vpack.c.bf16 %v1577_v51, %v1577_v51  ;;  %v1593_v55 = vsel %vm1461_vm14, %v1397_v38, %v1529_v46  ;;  %v1366_v56 = vadd.f32 %v2646_v34, %v1298_v47  ;;  %v1262_v57 = vld [vmem:[#allocation2 + $0x1e8] sm:$0xff]  ;;  %983 = vst.msk [vmem:[#allocation2 + $0x170] sm:$0xff] %vm936_vm3, %v887_v45 }
 0x111   : > { %v1657_v58 = vpack.c.bf16 %v1593_v55, %v1593_v55  ;;  %v1546_v59 = vsel %vm1414_vm15, %v1350_v41, %v1482_v52  ;;  %v1382_v60 = vadd.f32 %v2646_v34, %v1314_v53  ;;  %v1330_v61 = vmul.f32 %v2638_v31, %v1262_v57  ;;  %999 = vst.msk [vmem:[#allocation2 + $0x1f0] sm:$0xff] %vm936_vm3, %v927_v49 }
 0x112   : > { %1706 = vst.msk [vmem:[%s2343_s16 + $0xb0] sm:$0xf] %vm1661_vm6, %v1641_v54  ;;  %v1610_v62 = vpack.c.bf16 %v1546_v59, %v1546_v59  ;;  %vm1430_vm0 = vcmp.ge.f32.partialorder %v1366_v56, 0.0  ;;  %v1498_v63 = vmul.f32 %v2657_v39, %v1366_v56 }
 0x113   : > { %1722 = vst.msk [vmem:[%s2343_s16 + $0xf0] sm:$0xf] %vm1661_vm6, %v1657_v58  ;;  %vm1446_vm1 = vcmp.ge.f32.partialorder %v1382_v60, 0.0  ;;  %v1514_v1 = vmul.f32 %v2657_v39, %v1382_v60  ;;  %v1398_v2 = vadd.f32 %v2646_v34, %v1330_v61  ;;  %v1215_v3 = vld [vmem:[#allocation2 + $0x70] sm:$0xff] }
 0x114   : > { %1675 = vst.msk [vmem:[%s2343_s16 + $0x34] sm:$0xf] %vm1661_vm6, %v1610_v62  ;;  %v1562_v5 = vsel %vm1430_vm0, %v1366_v56, %v1498_v63  ;;  %v1283_v6 = vmul.f32 %v2638_v31, %v1215_v3 }
 0x115   : > { %v1626_v7 = vpack.c.bf16 %v1562_v5, %v1562_v5  ;;  %v1578_v8 = vsel %vm1446_vm1, %v1382_v60, %v1514_v1  ;;  %vm1462_vm2 = vcmp.ge.f32.partialorder %v1398_v2, 0.0  ;;  %v1530_v9 = vmul.f32 %v2657_v39, %v1398_v2  ;;  %952 = vst.msk [vmem:[#allocation2 + $0x78] sm:$0xff] %vm936_vm3, %v809_v0  ;;  %v889_v13 = vpop.f32.mrf.mxu2  ;;  %v929_v21 = vpop.f32.mrf.mxu3 }
 0x116   : > { %v1642_v10 = vpack.c.bf16 %v1578_v8, %v1578_v8  ;;  %v1351_v11 = vadd.f32 %v2646_v34, %v1283_v6  ;;  %v1231_v12 = vld [vmem:[#allocation2 + $0xf0] sm:$0xff]  ;;  %968 = vst.msk [vmem:[#allocation2 + $0xf8] sm:$0xff] %vm936_vm3, %v849_v4 }
 0x117   : > { %1691 = vst.msk [vmem:[%s2343_s16 + $0x74] sm:$0xf] %vm1661_vm6, %v1626_v7  ;;  %v1594_v14 = vsel %vm1462_vm2, %v1398_v2, %v1530_v9  ;;  %v1299_v15 = vmul.f32 %v2638_v31, %v1231_v12  ;;  %v1247_v16 = vld [vmem:[#allocation2 + $0x170] sm:$0xff] }
 0x118   : > { %1707 = vst.msk [vmem:[%s2343_s16 + $0xb4] sm:$0xf] %vm1661_vm6, %v1642_v10  ;;  %v1658_v17 = vpack.c.bf16 %v1594_v14, %v1594_v14  ;;  %vm1415_vm4 = vcmp.ge.f32.partialorder %v1351_v11, 0.0  ;;  %v1483_v18 = vmul.f32 %v2657_v39, %v1351_v11  ;;  %v1315_v19 = vmul.f32 %v2638_v31, %v1247_v16  ;;  %v1263_v20 = vld [vmem:[#allocation2 + $0x1f0] sm:$0xff] }
 0x119   : > { %v1367_v22 = vadd.f32 %v2646_v34, %v1299_v15  ;;  %v1331_v23 = vmul.f32 %v2638_v31, %v1263_v20  ;;  %984 = vst.msk [vmem:[#allocation2 + $0x178] sm:$0xff] %vm936_vm3, %v889_v13 }
 0x11a   : > { %1723 = vst.msk [vmem:[%s2343_s16 + $0xf4] sm:$0xf] %vm1661_vm6, %v1658_v17  ;;  %v1547_v24 = vsel %vm1415_vm4, %v1351_v11, %v1483_v18  ;;  %v1383_v25 = vadd.f32 %v2646_v34, %v1315_v19 }
 0x11b   : > { %v1611_v26 = vpack.c.bf16 %v1547_v24, %v1547_v24  ;;  %vm1431_vm5 = vcmp.ge.f32.partialorder %v1367_v22, 0.0  ;;  %v1499_v27 = vmul.f32 %v2657_v39, %v1367_v22  ;;  %v1399_v28 = vadd.f32 %v2646_v34, %v1331_v23  ;;  %1000 = vst.msk [vmem:[#allocation2 + $0x1f8] sm:$0xff] %vm936_vm3, %v929_v21 }
 0x11c   : > { %vm1447_vm7 = vcmp.ge.f32.partialorder %v1383_v25, 0.0  ;;  %v1515_v43 = vmul.f32 %v2657_v39, %v1383_v25  ;;  %v1216_v29 = vld [vmem:[#allocation2 + $0x78] sm:$0xff] }
 0x11d   : > { %1676 = vst.msk [vmem:[%s2343_s16 + $0x38] sm:$0xf] %vm1661_vm6, %v1611_v26  ;;  %v1563_v30 = vsel %vm1431_vm5, %v1367_v22, %v1499_v27  ;;  %vm1463_vm8 = vcmp.ge.f32.partialorder %v1399_v28, 0.0  ;;  %v1531_v32 = vmul.f32 %v2657_v39, %v1399_v28  ;;  %v1284_v33 = vmul.f32 %v2638_v31, %v1216_v29  ;;  %v1232_v50 = vld [vmem:[#allocation2 + $0xf8] sm:$0xff] }
 0x11e   : > { %v1627_v42 = vpack.c.bf16 %v1563_v30, %v1563_v30  ;;  %v1579_v35 = vsel %vm1447_vm7, %v1383_v25, %v1515_v43  ;;  %v1300_v36 = vmul.f32 %v2638_v31, %v1232_v50 }
 0x11f   : > { %v1643_v37 = vpack.c.bf16 %v1579_v35, %v1579_v35  ;;  %v1595_v38 = vsel %vm1463_vm8, %v1399_v28, %v1531_v32  ;;  %v1352_v40 = vadd.f32 %v2646_v34, %v1284_v33 }
 0x120   : > { %1692 = vst.msk [vmem:[%s2343_s16 + $0x78] sm:$0xf] %vm1661_vm6, %v1627_v42  ;;  %v1659_v41 = vpack.c.bf16 %v1595_v38, %v1595_v38  ;;  %v1368_v44 = vadd.f32 %v2646_v34, %v1300_v36  ;;  %v1248_v45 = vld [vmem:[#allocation2 + $0x178] sm:$0xff] }
 0x121   : > { %1708 = vst.msk [vmem:[%s2343_s16 + $0xb8] sm:$0xf] %vm1661_vm6, %v1643_v37  ;;  %vm1416_vm3 = vcmp.ge.f32.partialorder %v1352_v40, 0.0  ;;  %v1484_v46 = vmul.f32 %v2657_v39, %v1352_v40  ;;  %v1316_v47 = vmul.f32 %v2638_v31, %v1248_v45 }
 0x122   : > { %1724 = vst.msk [vmem:[%s2343_s16 + $0xf8] sm:$0xf] %vm1661_vm6, %v1659_v41  ;;  %vm1432_vm9 = vcmp.ge.f32.partialorder %v1368_v44, 0.0  ;;  %v1500_v48 = vmul.f32 %v2657_v39, %v1368_v44  ;;  %v1264_v49 = vld [vmem:[#allocation2 + $0x1f8] sm:$0xff] }
 0x123   : > { %v1548_v51 = vsel %vm1416_vm3, %v1352_v40, %v1484_v46  ;;  %v1384_v52 = vadd.f32 %v2646_v34, %v1316_v47  ;;  %v1332_v53 = vmul.f32 %v2638_v31, %v1264_v49 }
 0x124   : > { %v1612_v54 = vpack.c.bf16 %v1548_v51, %v1548_v51  ;;  %v1564_v55 = vsel %vm1432_vm9, %v1368_v44, %v1500_v48 }
 0x125   : > { %v1628_v56 = vpack.c.bf16 %v1564_v55, %v1564_v55  ;;  %vm1448_vm10 = vcmp.ge.f32.partialorder %v1384_v52, 0.0  ;;  %v1516_v57 = vmul.f32 %v2657_v39, %v1384_v52  ;;  %v1400_v58 = vadd.f32 %v2646_v34, %v1332_v53 }
 0x126   : > { %1677 = vst.msk [vmem:[%s2343_s16 + $0x3c] sm:$0xf] %vm1661_vm6, %v1612_v54 }
 0x127   : > { %1693 = vst.msk [vmem:[%s2343_s16 + $0x7c] sm:$0xf] %vm1661_vm6, %v1628_v56  ;;  %v1580_v59 = vsel %vm1448_vm10, %v1384_v52, %v1516_v57  ;;  %vm1464_vm11 = vcmp.ge.f32.partialorder %v1400_v58, 0.0  ;;  %v1532_v60 = vmul.f32 %v2657_v39, %v1400_v58 }
 0x128   : > { %v1644_v61 = vpack.c.bf16 %v1580_v59, %v1580_v59 }
 0x129   : > { %v1596_v62 = vsel %vm1464_vm11, %v1400_v58, %v1532_v60 }
 0x12a   : > { %1709 = vst.msk [vmem:[%s2343_s16 + $0xbc] sm:$0xf] %vm1661_vm6, %v1644_v61  ;;  %v1660_v31 = vpack.c.bf16 %v1596_v62, %v1596_v62 }
 0x12c   : > { %1725 = vst.msk [vmem:[%s2343_s16 + $0xfc] sm:$0xf] %vm1661_vm6, %v1660_v31 }
 0x12d PF: > { %s15_s20 = sadd.s32 1, %s2177_s20   ;;  %s2748_s18 = smov %s2173_s19 }
 0x12e   : > { %p12_p5 = scmp.ge.s32.totalorder %s15_s20, 18   ;;  %s2749_s19 = smov %s2751_s21 }
 0x130   :  { %14 = sbr.rel (!%p12_p5) target bundleno = 2 (0x2), region = 94 }

</bundles_post_ra>
